<compile_context>
chip_gen: v6e
topology: v6e:2x2x1
jax: 0.10.0
libtpu: 0.0.40
codegen_flags: <defaults>
</compile_context>

<pallas_src>
import functools

import jax
import jax.numpy as jnp
from jax.experimental import pallas as pl
from jax.experimental.pallas import tpu as pltpu


def _pick_row_tile(h2, cap):
    """Largest tile of h2-rows <= cap that tiles H/2 exactly and keeps the
    block's second-minor dim legal (multiple of 8, or the full dimension)."""
    for t in range(min(h2, cap), 0, -1):
        if h2 % t == 0 and (t % 8 == 0 or t == h2):
            return t
    return h2


def _focus_cbl_kernel(x_ref, q_ref, w_ref, shift_ref, o_ref, *, n_rows):
    """One (row-block, batch) tile: fused space-to-depth + 1x1 conv + BN + SiLU.

    x_ref     : (C, n_rows, 2W)  input row-pairs; lanes = [h-even row | h-odd row]
    q_ref     : (4, 2W, W2)      0/1 phase-selection (im2col) matrices
    w_ref     : (4, Cout, C)     per-phase conv weight, BN scale folded in
    shift_ref : (Cout, 1)        folded BN shift (f32)
    o_ref     : (Cout, n_rows, W2)
    """
    shift = shift_ref[...]                                   # (Cout, 1) f32
    for r in range(n_rows):                                  # static, unrolled
        xrow = x_ref[:, r, :]                                # (C, 2W) native dtype
        y = jnp.zeros((o_ref.shape[0], o_ref.shape[2]), jnp.float32)
        for p in range(4):
            # Gather phase p (h-parity half + w-parity deinterleave) on the MXU.
            u = jnp.dot(xrow, q_ref[p],
                        preferred_element_type=xrow.dtype)   # (C, W2)
            # 1x1-conv contribution of phase p (BN scale already folded in).
            y = y + jnp.dot(w_ref[p], u,
                            preferred_element_type=jnp.float32)  # (Cout, W2)
        y = y + shift                                        # folded BatchNorm
        o_ref[:, r, :] = (y * jax.nn.sigmoid(y)).astype(o_ref.dtype)   # SiLU


@functools.partial(jax.jit, static_argnames=("eps", "h2_tile"))
def focus_forward(x_nchw, w_oihw, gamma, beta, running_mean, running_var,
                  eps=1e-5, h2_tile=32):
    N, C, H, W = x_nchw.shape
    assert H % 2 == 0 and W % 2 == 0, "Focus needs even spatial dims"
    H2, W2 = H // 2, W // 2
    Cout = w_oihw.shape[0]
    assert w_oihw.shape[1] == 4 * C

    th2 = _pick_row_tile(H2, h2_tile)

    # Free (metadata-only) view: xv[n, c, h2, j] = x[n, c, 2*h2 + j // W, j % W]
    xv = x_nchw.reshape(N, C, H2, 2 * W)

    # Fold inference BatchNorm into a per-channel scale (into the weight) + shift.
    f32 = jnp.float32
    inv_std = 1.0 / jnp.sqrt(running_var.astype(f32) + eps)
    scale = gamma.astype(f32) * inv_std                            # (Cout,)
    shift = (beta.astype(f32) - running_mean.astype(f32) * scale).reshape(Cout, 1)

    # torch.cat order is phase-major: [ee, oe, eo, oo] blocks of C input channels.
    wm = w_oihw.reshape(Cout, 4, C).astype(f32)                    # (Cout, 4, C)
    wm = jnp.transpose(wm, (1, 0, 2)) * scale[None, :, None]       # (4, Cout, C)
    wm = wm.astype(x_nchw.dtype)

    # Phase-selection matrices: q[p, j, w2] = 1 iff lane j of a row-pair holds
    # x[..., 2*h2 + ph, 2*w2 + pw] for phase p = (ph, pw).  Exact 0/1 values.
    j = jnp.arange(2 * W, dtype=jnp.int32)[:, None]
    w2 = jnp.arange(W2, dtype=jnp.int32)[None, :]
    phases = ((0, 0), (1, 0), (0, 1), (1, 1))      # matches the torch.cat order
    q = jnp.stack([(j == ph * W + 2 * w2 + pw).astype(x_nchw.dtype)
                   for ph, pw in phases], axis=0)                  # (4, 2W, W2)

    kernel = functools.partial(_focus_cbl_kernel, n_rows=th2)
    out = pl.pallas_call(
        kernel,
        out_shape=jax.ShapeDtypeStruct((N, Cout, H2, W2), x_nchw.dtype),
        grid=(H2 // th2, N),
        in_specs=[
            pl.BlockSpec((None, C, th2, 2 * W), lambda i, n: (n, 0, i, 0)),
            pl.BlockSpec((4, 2 * W, W2), lambda i, n: (0, 0, 0)),   # resident
            pl.BlockSpec((4, Cout, C), lambda i, n: (0, 0, 0)),     # resident
            pl.BlockSpec((Cout, 1), lambda i, n: (0, 0)),           # resident
        ],
        out_specs=pl.BlockSpec((None, Cout, th2, W2), lambda i, n: (n, 0, i, 0)),
        compiler_params=pltpu.CompilerParams(
            dimension_semantics=("parallel", "parallel")),
    )(xv, q, wm, shift)
    return out   # already NCHW: (N, Cout, H/2, W/2)


def _reference(x_nchw, w_oihw, gamma, beta, running_mean, running_var, eps=1e-5):
    a = x_nchw[..., ::2, ::2]
    b = x_nchw[..., 1::2, ::2]
    c = x_nchw[..., ::2, 1::2]
    d = x_nchw[..., 1::2, 1::2]
    xc = jnp.concatenate([a, b, c, d], axis=1).astype(jnp.float32)
    Cout = w_oihw.shape[0]
    w2d = w_oihw.reshape(Cout, -1).astype(jnp.float32)
    y = jnp.einsum("nchw,oc->nohw", xc, w2d,
                   precision=jax.lax.Precision.HIGHEST)
    inv_std = 1.0 / jnp.sqrt(running_var.astype(jnp.float32) + eps)
    y = (y - running_mean[None, :, None, None]) * inv_std[None, :, None, None]
    y = y * gamma[None, :, None, None] + beta[None, :, None, None]
    return y * jax.nn.sigmoid(y)


if __name__ == "__main__":
    key = jax.random.PRNGKey(0)
    k_x, k_w, k_g, k_b, k_m, k_v = jax.random.split(key, 6)

    N, C, H, W = 2, 4, 16, 16
    Cout = 8
    C4 = 4 * C

    x = jax.random.normal(k_x, (N, C, H, W), dtype=jnp.float32)
    # Conv2d(4C, Cout, kernel_size=1, bias=False) weight: (Cout, 4C, 1, 1)
    w = jax.random.normal(k_w, (Cout, C4, 1, 1), dtype=jnp.float32) * 0.1
    # BatchNorm2d(Cout) params / running stats (inference mode)
    gamma = 1.0 + 0.1 * jax.random.normal(k_g, (Cout,), dtype=jnp.float32)
    beta = 0.1 * jax.random.normal(k_b, (Cout,), dtype=jnp.float32)
    running_mean = 0.1 * jax.random.normal(k_m, (Cout,), dtype=jnp.float32)
    running_var = 1.0 + 0.1 * jax.random.uniform(k_v, (Cout,), dtype=jnp.float32)

    out = focus_forward(x, w, gamma, beta, running_mean, running_var)
    out = jax.block_until_ready(out)

    ref = _reference(x, w, gamma, beta, running_mean, running_var)
    assert out.shape == (N, Cout, H // 2, W // 2), out.shape
    assert jnp.allclose(out, ref, atol=2e-3, rtol=2e-3), (
        "mismatch vs reference: max abs err = "
        f"{float(jnp.max(jnp.abs(out - ref)))}")

    print("KERNEL_OK")
</pallas_src>

<mosaic_0001>
module attributes {stable_mosaic.version = 11 : i64} {
  func.func @_focus_cbl_kernel(%arg0: i32, %arg1: i32, %arg2: memref<1x4x8x32xf32, #tpu.memory_space<vmem>>, %arg3: memref<4x32x8xf32, #tpu.memory_space<vmem>>, %arg4: memref<4x8x4xf32, #tpu.memory_space<vmem>>, %arg5: memref<8x1xf32, #tpu.memory_space<vmem>>, %arg6: memref<1x8x8x8xf32, #tpu.memory_space<vmem>>) attributes {dimension_semantics = [#tpu.dimension_semantics<parallel>, #tpu.dimension_semantics<parallel>], iteration_bounds = array<i64: 1, 2>, scalar_prefetch = 0 : i64, scratch_operands = 0 : i64, tpu.core_type = #tpu.core_type<tc>, window_params = [{transform_indices = @transform_0, window_bounds = array<i64: 1, 4, 8, 32>}, {pipeline_mode = #tpu.pipeline_mode<synchronous>, transform_indices = @transform_1, window_bounds = array<i64: 4, 32, 8>}, {pipeline_mode = #tpu.pipeline_mode<synchronous>, transform_indices = @transform_2, window_bounds = array<i64: 4, 8, 4>}, {pipeline_mode = #tpu.pipeline_mode<synchronous>, transform_indices = @transform_3, window_bounds = array<i64: 8, 1>}, {transform_indices = @transform_4, window_bounds = array<i64: 1, 8, 8, 8>}]} {
    %c0 = arith.constant 0 : index
    %c0_0 = arith.constant 0 : index
    %0 = vector.load %arg5[%c0, %c0_0] : memref<8x1xf32, #tpu.memory_space<vmem>>, vector<8x1xf32>
    %c0_1 = arith.constant 0 : index
    %c0_2 = arith.constant 0 : index
    %c0_3 = arith.constant 0 : index
    %c0_4 = arith.constant 0 : index
    %1 = vector.load %arg2[%c0_1, %c0_2, %c0_3, %c0_4] : memref<1x4x8x32xf32, #tpu.memory_space<vmem>>, vector<1x4x1x32xf32>
    %2 = vector.shape_cast %1 : vector<1x4x1x32xf32> to vector<4x32xf32>
    %cst = arith.constant 0.000000e+00 : f32
    %3 = vector.broadcast %cst : f32 to vector<8x8xf32>
    %c0_5 = arith.constant 0 : index
    %c0_6 = arith.constant 0 : index
    %c0_7 = arith.constant 0 : index
    %4 = vector.load %arg3[%c0_5, %c0_6, %c0_7] : memref<4x32x8xf32, #tpu.memory_space<vmem>>, vector<1x32x8xf32>
    %5 = vector.shape_cast %4 : vector<1x32x8xf32> to vector<32x8xf32>
    %cst_8 = arith.constant dense<0.000000e+00> : vector<4x8xf32>
    %6 = tpu.matmul %2, %5, %cst_8 {dimension_numbers = #tpu.dot_dimension_numbers<[1], [0], [0], [1], [0, 0, 1, 1], [], []>} : vector<4x32xf32>, vector<32x8xf32>, vector<4x8xf32> -> vector<4x8xf32>
    %c0_9 = arith.constant 0 : index
    %c0_10 = arith.constant 0 : index
    %c0_11 = arith.constant 0 : index
    %7 = vector.load %arg4[%c0_9, %c0_10, %c0_11] : memref<4x8x4xf32, #tpu.memory_space<vmem>>, vector<1x8x4xf32>
    %8 = vector.shape_cast %7 : vector<1x8x4xf32> to vector<8x4xf32>
    %cst_12 = arith.constant dense<0.000000e+00> : vector<8x8xf32>
    %9 = tpu.matmul %8, %6, %cst_12 {dimension_numbers = #tpu.dot_dimension_numbers<[1], [0], [0], [1], [0, 0, 1, 1], [], []>} : vector<8x4xf32>, vector<4x8xf32>, vector<8x8xf32> -> vector<8x8xf32>
    %10 = arith.addf %3, %9 : vector<8x8xf32>
    %c1 = arith.constant 1 : index
    %c0_13 = arith.constant 0 : index
    %c0_14 = arith.constant 0 : index
    %11 = vector.load %arg3[%c1, %c0_13, %c0_14] : memref<4x32x8xf32, #tpu.memory_space<vmem>>, vector<1x32x8xf32>
    %12 = vector.shape_cast %11 : vector<1x32x8xf32> to vector<32x8xf32>
    %cst_15 = arith.constant dense<0.000000e+00> : vector<4x8xf32>
    %13 = tpu.matmul %2, %12, %cst_15 {dimension_numbers = #tpu.dot_dimension_numbers<[1], [0], [0], [1], [0, 0, 1, 1], [], []>} : vector<4x32xf32>, vector<32x8xf32>, vector<4x8xf32> -> vector<4x8xf32>
    %c1_16 = arith.constant 1 : index
    %c0_17 = arith.constant 0 : index
    %c0_18 = arith.constant 0 : index
    %14 = vector.load %arg4[%c1_16, %c0_17, %c0_18] : memref<4x8x4xf32, #tpu.memory_space<vmem>>, vector<1x8x4xf32>
    %15 = vector.shape_cast %14 : vector<1x8x4xf32> to vector<8x4xf32>
    %cst_19 = arith.constant dense<0.000000e+00> : vector<8x8xf32>
    %16 = tpu.matmul %15, %13, %cst_19 {dimension_numbers = #tpu.dot_dimension_numbers<[1], [0], [0], [1], [0, 0, 1, 1], [], []>} : vector<8x4xf32>, vector<4x8xf32>, vector<8x8xf32> -> vector<8x8xf32>
    %17 = arith.addf %10, %16 : vector<8x8xf32>
    %c2 = arith.constant 2 : index
    %c0_20 = arith.constant 0 : index
    %c0_21 = arith.constant 0 : index
    %18 = vector.load %arg3[%c2, %c0_20, %c0_21] : memref<4x32x8xf32, #tpu.memory_space<vmem>>, vector<1x32x8xf32>
    %19 = vector.shape_cast %18 : vector<1x32x8xf32> to vector<32x8xf32>
    %cst_22 = arith.constant dense<0.000000e+00> : vector<4x8xf32>
    %20 = tpu.matmul %2, %19, %cst_22 {dimension_numbers = #tpu.dot_dimension_numbers<[1], [0], [0], [1], [0, 0, 1, 1], [], []>} : vector<4x32xf32>, vector<32x8xf32>, vector<4x8xf32> -> vector<4x8xf32>
    %c2_23 = arith.constant 2 : index
    %c0_24 = arith.constant 0 : index
    %c0_25 = arith.constant 0 : index
    %21 = vector.load %arg4[%c2_23, %c0_24, %c0_25] : memref<4x8x4xf32, #tpu.memory_space<vmem>>, vector<1x8x4xf32>
    %22 = vector.shape_cast %21 : vector<1x8x4xf32> to vector<8x4xf32>
    %cst_26 = arith.constant dense<0.000000e+00> : vector<8x8xf32>
    %23 = tpu.matmul %22, %20, %cst_26 {dimension_numbers = #tpu.dot_dimension_numbers<[1], [0], [0], [1], [0, 0, 1, 1], [], []>} : vector<8x4xf32>, vector<4x8xf32>, vector<8x8xf32> -> vector<8x8xf32>
    %24 = arith.addf %17, %23 : vector<8x8xf32>
    %c3 = arith.constant 3 : index
    %c0_27 = arith.constant 0 : index
    %c0_28 = arith.constant 0 : index
    %25 = vector.load %arg3[%c3, %c0_27, %c0_28] : memref<4x32x8xf32, #tpu.memory_space<vmem>>, vector<1x32x8xf32>
    %26 = vector.shape_cast %25 : vector<1x32x8xf32> to vector<32x8xf32>
    %cst_29 = arith.constant dense<0.000000e+00> : vector<4x8xf32>
    %27 = tpu.matmul %2, %26, %cst_29 {dimension_numbers = #tpu.dot_dimension_numbers<[1], [0], [0], [1], [0, 0, 1, 1], [], []>} : vector<4x32xf32>, vector<32x8xf32>, vector<4x8xf32> -> vector<4x8xf32>
    %c3_30 = arith.constant 3 : index
    %c0_31 = arith.constant 0 : index
    %c0_32 = arith.constant 0 : index
    %28 = vector.load %arg4[%c3_30, %c0_31, %c0_32] : memref<4x8x4xf32, #tpu.memory_space<vmem>>, vector<1x8x4xf32>
    %29 = vector.shape_cast %28 : vector<1x8x4xf32> to vector<8x4xf32>
    %cst_33 = arith.constant dense<0.000000e+00> : vector<8x8xf32>
    %30 = tpu.matmul %29, %27, %cst_33 {dimension_numbers = #tpu.dot_dimension_numbers<[1], [0], [0], [1], [0, 0, 1, 1], [], []>} : vector<8x4xf32>, vector<4x8xf32>, vector<8x8xf32> -> vector<8x8xf32>
    %31 = arith.addf %24, %30 : vector<8x8xf32>
    %32 = vector.broadcast %0 : vector<8x1xf32> to vector<8x8xf32>
    %33 = arith.addf %31, %32 : vector<8x8xf32>
    %34 = arith.negf %33 : vector<8x8xf32>
    %35 = math.exp %34 : vector<8x8xf32>
    %cst_34 = arith.constant 1.000000e+00 : f32
    %36 = vector.broadcast %cst_34 : f32 to vector<8x8xf32>
    %37 = arith.addf %36, %35 : vector<8x8xf32>
    %38 = arith.divf %36, %37 : vector<8x8xf32>
    %39 = arith.mulf %33, %38 : vector<8x8xf32>
    %c0_35 = arith.constant 0 : index
    %c0_36 = arith.constant 0 : index
    %c0_37 = arith.constant 0 : index
    %c0_38 = arith.constant 0 : index
    %40 = vector.load %arg6[%c0_35, %c0_36, %c0_37, %c0_38] : memref<1x8x8x8xf32, #tpu.memory_space<vmem>>, vector<1x8x1x8xf32>
    %41 = vector.shape_cast %40 : vector<1x8x1x8xf32> to vector<8x8xf32>
    %42 = vector.shape_cast %39 : vector<8x8xf32> to vector<1x8x1x8xf32>
    tpu.vector_store %arg6[%c0_35, %c0_36, %c0_37, %c0_38], %42 {strides = array<i32>} : memref<1x8x8x8xf32, #tpu.memory_space<vmem>>, vector<1x8x1x8xf32>,
    %c0_39 = arith.constant 0 : index
    %c0_40 = arith.constant 0 : index
    %c1_41 = arith.constant 1 : index
    %c0_42 = arith.constant 0 : index
    %43 = vector.load %arg2[%c0_39, %c0_40, %c1_41, %c0_42] : memref<1x4x8x32xf32, #tpu.memory_space<vmem>>, vector<1x4x1x32xf32>
    %44 = vector.shape_cast %43 : vector<1x4x1x32xf32> to vector<4x32xf32>
    %cst_43 = arith.constant 0.000000e+00 : f32
    %45 = vector.broadcast %cst_43 : f32 to vector<8x8xf32>
    %c0_44 = arith.constant 0 : index
    %c0_45 = arith.constant 0 : index
    %c0_46 = arith.constant 0 : index
    %46 = vector.load %arg3[%c0_44, %c0_45, %c0_46] : memref<4x32x8xf32, #tpu.memory_space<vmem>>, vector<1x32x8xf32>
    %47 = vector.shape_cast %46 : vector<1x32x8xf32> to vector<32x8xf32>
    %cst_47 = arith.constant dense<0.000000e+00> : vector<4x8xf32>
    %48 = tpu.matmul %44, %47, %cst_47 {dimension_numbers = #tpu.dot_dimension_numbers<[1], [0], [0], [1], [0, 0, 1, 1], [], []>} : vector<4x32xf32>, vector<32x8xf32>, vector<4x8xf32> -> vector<4x8xf32>
    %c0_48 = arith.constant 0 : index
    %c0_49 = arith.constant 0 : index
    %c0_50 = arith.constant 0 : index
    %49 = vector.load %arg4[%c0_48, %c0_49, %c0_50] : memref<4x8x4xf32, #tpu.memory_space<vmem>>, vector<1x8x4xf32>
    %50 = vector.shape_cast %49 : vector<1x8x4xf32> to vector<8x4xf32>
    %cst_51 = arith.constant dense<0.000000e+00> : vector<8x8xf32>
    %51 = tpu.matmul %50, %48, %cst_51 {dimension_numbers = #tpu.dot_dimension_numbers<[1], [0], [0], [1], [0, 0, 1, 1], [], []>} : vector<8x4xf32>, vector<4x8xf32>, vector<8x8xf32> -> vector<8x8xf32>
    %52 = arith.addf %45, %51 : vector<8x8xf32>
    %c1_52 = arith.constant 1 : index
    %c0_53 = arith.constant 0 : index
    %c0_54 = arith.constant 0 : index
    %53 = vector.load %arg3[%c1_52, %c0_53, %c0_54] : memref<4x32x8xf32, #tpu.memory_space<vmem>>, vector<1x32x8xf32>
    %54 = vector.shape_cast %53 : vector<1x32x8xf32> to vector<32x8xf32>
    %cst_55 = arith.constant dense<0.000000e+00> : vector<4x8xf32>
    %55 = tpu.matmul %44, %54, %cst_55 {dimension_numbers = #tpu.dot_dimension_numbers<[1], [0], [0], [1], [0, 0, 1, 1], [], []>} : vector<4x32xf32>, vector<32x8xf32>, vector<4x8xf32> -> vector<4x8xf32>
    %c1_56 = arith.constant 1 : index
    %c0_57 = arith.constant 0 : index
    %c0_58 = arith.constant 0 : index
    %56 = vector.load %arg4[%c1_56, %c0_57, %c0_58] : memref<4x8x4xf32, #tpu.memory_space<vmem>>, vector<1x8x4xf32>
    %57 = vector.shape_cast %56 : vector<1x8x4xf32> to vector<8x4xf32>
    %cst_59 = arith.constant dense<0.000000e+00> : vector<8x8xf32>
    %58 = tpu.matmul %57, %55, %cst_59 {dimension_numbers = #tpu.dot_dimension_numbers<[1], [0], [0], [1], [0, 0, 1, 1], [], []>} : vector<8x4xf32>, vector<4x8xf32>, vector<8x8xf32> -> vector<8x8xf32>
    %59 = arith.addf %52, %58 : vector<8x8xf32>
    %c2_60 = arith.constant 2 : index
    %c0_61 = arith.constant 0 : index
    %c0_62 = arith.constant 0 : index
    %60 = vector.load %arg3[%c2_60, %c0_61, %c0_62] : memref<4x32x8xf32, #tpu.memory_space<vmem>>, vector<1x32x8xf32>
    %61 = vector.shape_cast %60 : vector<1x32x8xf32> to vector<32x8xf32>
    %cst_63 = arith.constant dense<0.000000e+00> : vector<4x8xf32>
    %62 = tpu.matmul %44, %61, %cst_63 {dimension_numbers = #tpu.dot_dimension_numbers<[1], [0], [0], [1], [0, 0, 1, 1], [], []>} : vector<4x32xf32>, vector<32x8xf32>, vector<4x8xf32> -> vector<4x8xf32>
    %c2_64 = arith.constant 2 : index
    %c0_65 = arith.constant 0 : index
    %c0_66 = arith.constant 0 : index
    %63 = vector.load %arg4[%c2_64, %c0_65, %c0_66] : memref<4x8x4xf32, #tpu.memory_space<vmem>>, vector<1x8x4xf32>
    %64 = vector.shape_cast %63 : vector<1x8x4xf32> to vector<8x4xf32>
    %cst_67 = arith.constant dense<0.000000e+00> : vector<8x8xf32>
    %65 = tpu.matmul %64, %62, %cst_67 {dimension_numbers = #tpu.dot_dimension_numbers<[1], [0], [0], [1], [0, 0, 1, 1], [], []>} : vector<8x4xf32>, vector<4x8xf32>, vector<8x8xf32> -> vector<8x8xf32>
    %66 = arith.addf %59, %65 : vector<8x8xf32>
    %c3_68 = arith.constant 3 : index
    %c0_69 = arith.constant 0 : index
    %c0_70 = arith.constant 0 : index
    %67 = vector.load %arg3[%c3_68, %c0_69, %c0_70] : memref<4x32x8xf32, #tpu.memory_space<vmem>>, vector<1x32x8xf32>
    %68 = vector.shape_cast %67 : vector<1x32x8xf32> to vector<32x8xf32>
    %cst_71 = arith.constant dense<0.000000e+00> : vector<4x8xf32>
    %69 = tpu.matmul %44, %68, %cst_71 {dimension_numbers = #tpu.dot_dimension_numbers<[1], [0], [0], [1], [0, 0, 1, 1], [], []>} : vector<4x32xf32>, vector<32x8xf32>, vector<4x8xf32> -> vector<4x8xf32>
    %c3_72 = arith.constant 3 : index
    %c0_73 = arith.constant 0 : index
    %c0_74 = arith.constant 0 : index
    %70 = vector.load %arg4[%c3_72, %c0_73, %c0_74] : memref<4x8x4xf32, #tpu.memory_space<vmem>>, vector<1x8x4xf32>
    %71 = vector.shape_cast %70 : vector<1x8x4xf32> to vector<8x4xf32>
    %cst_75 = arith.constant dense<0.000000e+00> : vector<8x8xf32>
    %72 = tpu.matmul %71, %69, %cst_75 {dimension_numbers = #tpu.dot_dimension_numbers<[1], [0], [0], [1], [0, 0, 1, 1], [], []>} : vector<8x4xf32>, vector<4x8xf32>, vector<8x8xf32> -> vector<8x8xf32>
    %73 = arith.addf %66, %72 : vector<8x8xf32>
    %74 = vector.broadcast %0 : vector<8x1xf32> to vector<8x8xf32>
    %75 = arith.addf %73, %74 : vector<8x8xf32>
    %76 = arith.negf %75 : vector<8x8xf32>
    %77 = math.exp %76 : vector<8x8xf32>
    %cst_76 = arith.constant 1.000000e+00 : f32
    %78 = vector.broadcast %cst_76 : f32 to vector<8x8xf32>
    %79 = arith.addf %78, %77 : vector<8x8xf32>
    %80 = arith.divf %78, %79 : vector<8x8xf32>
    %81 = arith.mulf %75, %80 : vector<8x8xf32>
    %c0_77 = arith.constant 0 : index
    %c0_78 = arith.constant 0 : index
    %c1_79 = arith.constant 1 : index
    %c0_80 = arith.constant 0 : index
    %82 = vector.load %arg6[%c0_77, %c0_78, %c1_79, %c0_80] : memref<1x8x8x8xf32, #tpu.memory_space<vmem>>, vector<1x8x1x8xf32>
    %83 = vector.shape_cast %82 : vector<1x8x1x8xf32> to vector<8x8xf32>
    %84 = vector.shape_cast %81 : vector<8x8xf32> to vector<1x8x1x8xf32>
    tpu.vector_store %arg6[%c0_77, %c0_78, %c1_79, %c0_80], %84 {strides = array<i32>} : memref<1x8x8x8xf32, #tpu.memory_space<vmem>>, vector<1x8x1x8xf32>,
    %c0_81 = arith.constant 0 : index
    %c0_82 = arith.constant 0 : index
    %c2_83 = arith.constant 2 : index
    %c0_84 = arith.constant 0 : index
    %85 = vector.load %arg2[%c0_81, %c0_82, %c2_83, %c0_84] : memref<1x4x8x32xf32, #tpu.memory_space<vmem>>, vector<1x4x1x32xf32>
    %86 = vector.shape_cast %85 : vector<1x4x1x32xf32> to vector<4x32xf32>
    %cst_85 = arith.constant 0.000000e+00 : f32
    %87 = vector.broadcast %cst_85 : f32 to vector<8x8xf32>
    %c0_86 = arith.constant 0 : index
    %c0_87 = arith.constant 0 : index
    %c0_88 = arith.constant 0 : index
    %88 = vector.load %arg3[%c0_86, %c0_87, %c0_88] : memref<4x32x8xf32, #tpu.memory_space<vmem>>, vector<1x32x8xf32>
    %89 = vector.shape_cast %88 : vector<1x32x8xf32> to vector<32x8xf32>
    %cst_89 = arith.constant dense<0.000000e+00> : vector<4x8xf32>
    %90 = tpu.matmul %86, %89, %cst_89 {dimension_numbers = #tpu.dot_dimension_numbers<[1], [0], [0], [1], [0, 0, 1, 1], [], []>} : vector<4x32xf32>, vector<32x8xf32>, vector<4x8xf32> -> vector<4x8xf32>
    %c0_90 = arith.constant 0 : index
    %c0_91 = arith.constant 0 : index
    %c0_92 = arith.constant 0 : index
    %91 = vector.load %arg4[%c0_90, %c0_91, %c0_92] : memref<4x8x4xf32, #tpu.memory_space<vmem>>, vector<1x8x4xf32>
    %92 = vector.shape_cast %91 : vector<1x8x4xf32> to vector<8x4xf32>
    %cst_93 = arith.constant dense<0.000000e+00> : vector<8x8xf32>
    %93 = tpu.matmul %92, %90, %cst_93 {dimension_numbers = #tpu.dot_dimension_numbers<[1], [0], [0], [1], [0, 0, 1, 1], [], []>} : vector<8x4xf32>, vector<4x8xf32>, vector<8x8xf32> -> vector<8x8xf32>
    %94 = arith.addf %87, %93 : vector<8x8xf32>
    %c1_94 = arith.constant 1 : index
    %c0_95 = arith.constant 0 : index
    %c0_96 = arith.constant 0 : index
    %95 = vector.load %arg3[%c1_94, %c0_95, %c0_96] : memref<4x32x8xf32, #tpu.memory_space<vmem>>, vector<1x32x8xf32>
    %96 = vector.shape_cast %95 : vector<1x32x8xf32> to vector<32x8xf32>
    %cst_97 = arith.constant dense<0.000000e+00> : vector<4x8xf32>
    %97 = tpu.matmul %86, %96, %cst_97 {dimension_numbers = #tpu.dot_dimension_numbers<[1], [0], [0], [1], [0, 0, 1, 1], [], []>} : vector<4x32xf32>, vector<32x8xf32>, vector<4x8xf32> -> vector<4x8xf32>
    %c1_98 = arith.constant 1 : index
    %c0_99 = arith.constant 0 : index
    %c0_100 = arith.constant 0 : index
    %98 = vector.load %arg4[%c1_98, %c0_99, %c0_100] : memref<4x8x4xf32, #tpu.memory_space<vmem>>, vector<1x8x4xf32>
    %99 = vector.shape_cast %98 : vector<1x8x4xf32> to vector<8x4xf32>
    %cst_101 = arith.constant dense<0.000000e+00> : vector<8x8xf32>
    %100 = tpu.matmul %99, %97, %cst_101 {dimension_numbers = #tpu.dot_dimension_numbers<[1], [0], [0], [1], [0, 0, 1, 1], [], []>} : vector<8x4xf32>, vector<4x8xf32>, vector<8x8xf32> -> vector<8x8xf32>
    %101 = arith.addf %94, %100 : vector<8x8xf32>
    %c2_102 = arith.constant 2 : index
    %c0_103 = arith.constant 0 : index
    %c0_104 = arith.constant 0 : index
    %102 = vector.load %arg3[%c2_102, %c0_103, %c0_104] : memref<4x32x8xf32, #tpu.memory_space<vmem>>, vector<1x32x8xf32>
    %103 = vector.shape_cast %102 : vector<1x32x8xf32> to vector<32x8xf32>
    %cst_105 = arith.constant dense<0.000000e+00> : vector<4x8xf32>
    %104 = tpu.matmul %86, %103, %cst_105 {dimension_numbers = #tpu.dot_dimension_numbers<[1], [0], [0], [1], [0, 0, 1, 1], [], []>} : vector<4x32xf32>, vector<32x8xf32>, vector<4x8xf32> -> vector<4x8xf32>
    %c2_106 = arith.constant 2 : index
    %c0_107 = arith.constant 0 : index
    %c0_108 = arith.constant 0 : index
    %105 = vector.load %arg4[%c2_106, %c0_107, %c0_108] : memref<4x8x4xf32, #tpu.memory_space<vmem>>, vector<1x8x4xf32>
    %106 = vector.shape_cast %105 : vector<1x8x4xf32> to vector<8x4xf32>
    %cst_109 = arith.constant dense<0.000000e+00> : vector<8x8xf32>
    %107 = tpu.matmul %106, %104, %cst_109 {dimension_numbers = #tpu.dot_dimension_numbers<[1], [0], [0], [1], [0, 0, 1, 1], [], []>} : vector<8x4xf32>, vector<4x8xf32>, vector<8x8xf32> -> vector<8x8xf32>
    %108 = arith.addf %101, %107 : vector<8x8xf32>
    %c3_110 = arith.constant 3 : index
    %c0_111 = arith.constant 0 : index
    %c0_112 = arith.constant 0 : index
    %109 = vector.load %arg3[%c3_110, %c0_111, %c0_112] : memref<4x32x8xf32, #tpu.memory_space<vmem>>, vector<1x32x8xf32>
    %110 = vector.shape_cast %109 : vector<1x32x8xf32> to vector<32x8xf32>
    %cst_113 = arith.constant dense<0.000000e+00> : vector<4x8xf32>
    %111 = tpu.matmul %86, %110, %cst_113 {dimension_numbers = #tpu.dot_dimension_numbers<[1], [0], [0], [1], [0, 0, 1, 1], [], []>} : vector<4x32xf32>, vector<32x8xf32>, vector<4x8xf32> -> vector<4x8xf32>
    %c3_114 = arith.constant 3 : index
    %c0_115 = arith.constant 0 : index
    %c0_116 = arith.constant 0 : index
    %112 = vector.load %arg4[%c3_114, %c0_115, %c0_116] : memref<4x8x4xf32, #tpu.memory_space<vmem>>, vector<1x8x4xf32>
    %113 = vector.shape_cast %112 : vector<1x8x4xf32> to vector<8x4xf32>
    %cst_117 = arith.constant dense<0.000000e+00> : vector<8x8xf32>
    %114 = tpu.matmul %113, %111, %cst_117 {dimension_numbers = #tpu.dot_dimension_numbers<[1], [0], [0], [1], [0, 0, 1, 1], [], []>} : vector<8x4xf32>, vector<4x8xf32>, vector<8x8xf32> -> vector<8x8xf32>
    %115 = arith.addf %108, %114 : vector<8x8xf32>
    %116 = vector.broadcast %0 : vector<8x1xf32> to vector<8x8xf32>
    %117 = arith.addf %115, %116 : vector<8x8xf32>
    %118 = arith.negf %117 : vector<8x8xf32>
    %119 = math.exp %118 : vector<8x8xf32>
    %cst_118 = arith.constant 1.000000e+00 : f32
    %120 = vector.broadcast %cst_118 : f32 to vector<8x8xf32>
    %121 = arith.addf %120, %119 : vector<8x8xf32>
    %122 = arith.divf %120, %121 : vector<8x8xf32>
    %123 = arith.mulf %117, %122 : vector<8x8xf32>
    %c0_119 = arith.constant 0 : index
    %c0_120 = arith.constant 0 : index
    %c2_121 = arith.constant 2 : index
    %c0_122 = arith.constant 0 : index
    %124 = vector.load %arg6[%c0_119, %c0_120, %c2_121, %c0_122] : memref<1x8x8x8xf32, #tpu.memory_space<vmem>>, vector<1x8x1x8xf32>
    %125 = vector.shape_cast %124 : vector<1x8x1x8xf32> to vector<8x8xf32>
    %126 = vector.shape_cast %123 : vector<8x8xf32> to vector<1x8x1x8xf32>
    tpu.vector_store %arg6[%c0_119, %c0_120, %c2_121, %c0_122], %126 {strides = array<i32>} : memref<1x8x8x8xf32, #tpu.memory_space<vmem>>, vector<1x8x1x8xf32>,
    %c0_123 = arith.constant 0 : index
    %c0_124 = arith.constant 0 : index
    %c3_125 = arith.constant 3 : index
    %c0_126 = arith.constant 0 : index
    %127 = vector.load %arg2[%c0_123, %c0_124, %c3_125, %c0_126] : memref<1x4x8x32xf32, #tpu.memory_space<vmem>>, vector<1x4x1x32xf32>
    %128 = vector.shape_cast %127 : vector<1x4x1x32xf32> to vector<4x32xf32>
    %cst_127 = arith.constant 0.000000e+00 : f32
    %129 = vector.broadcast %cst_127 : f32 to vector<8x8xf32>
    %c0_128 = arith.constant 0 : index
    %c0_129 = arith.constant 0 : index
    %c0_130 = arith.constant 0 : index
    %130 = vector.load %arg3[%c0_128, %c0_129, %c0_130] : memref<4x32x8xf32, #tpu.memory_space<vmem>>, vector<1x32x8xf32>
    %131 = vector.shape_cast %130 : vector<1x32x8xf32> to vector<32x8xf32>
    %cst_131 = arith.constant dense<0.000000e+00> : vector<4x8xf32>
    %132 = tpu.matmul %128, %131, %cst_131 {dimension_numbers = #tpu.dot_dimension_numbers<[1], [0], [0], [1], [0, 0, 1, 1], [], []>} : vector<4x32xf32>, vector<32x8xf32>, vector<4x8xf32> -> vector<4x8xf32>
    %c0_132 = arith.constant 0 : index
    %c0_133 = arith.constant 0 : index
    %c0_134 = arith.constant 0 : index
    %133 = vector.load %arg4[%c0_132, %c0_133, %c0_134] : memref<4x8x4xf32, #tpu.memory_space<vmem>>, vector<1x8x4xf32>
    %134 = vector.shape_cast %133 : vector<1x8x4xf32> to vector<8x4xf32>
    %cst_135 = arith.constant dense<0.000000e+00> : vector<8x8xf32>
    %135 = tpu.matmul %134, %132, %cst_135 {dimension_numbers = #tpu.dot_dimension_numbers<[1], [0], [0], [1], [0, 0, 1, 1], [], []>} : vector<8x4xf32>, vector<4x8xf32>, vector<8x8xf32> -> vector<8x8xf32>
    %136 = arith.addf %129, %135 : vector<8x8xf32>
    %c1_136 = arith.constant 1 : index
    %c0_137 = arith.constant 0 : index
    %c0_138 = arith.constant 0 : index
    %137 = vector.load %arg3[%c1_136, %c0_137, %c0_138] : memref<4x32x8xf32, #tpu.memory_space<vmem>>, vector<1x32x8xf32>
    %138 = vector.shape_cast %137 : vector<1x32x8xf32> to vector<32x8xf32>
    %cst_139 = arith.constant dense<0.000000e+00> : vector<4x8xf32>
    %139 = tpu.matmul %128, %138, %cst_139 {dimension_numbers = #tpu.dot_dimension_numbers<[1], [0], [0], [1], [0, 0, 1, 1], [], []>} : vector<4x32xf32>, vector<32x8xf32>, vector<4x8xf32> -> vector<4x8xf32>
    %c1_140 = arith.constant 1 : index
    %c0_141 = arith.constant 0 : index
    %c0_142 = arith.constant 0 : index
    %140 = vector.load %arg4[%c1_140, %c0_141, %c0_142] : memref<4x8x4xf32, #tpu.memory_space<vmem>>, vector<1x8x4xf32>
    %141 = vector.shape_cast %140 : vector<1x8x4xf32> to vector<8x4xf32>
    %cst_143 = arith.constant dense<0.000000e+00> : vector<8x8xf32>
    %142 = tpu.matmul %141, %139, %cst_143 {dimension_numbers = #tpu.dot_dimension_numbers<[1], [0], [0], [1], [0, 0, 1, 1], [], []>} : vector<8x4xf32>, vector<4x8xf32>, vector<8x8xf32> -> vector<8x8xf32>
    %143 = arith.addf %136, %142 : vector<8x8xf32>
    %c2_144 = arith.constant 2 : index
    %c0_145 = arith.constant 0 : index
    %c0_146 = arith.constant 0 : index
    %144 = vector.load %arg3[%c2_144, %c0_145, %c0_146] : memref<4x32x8xf32, #tpu.memory_space<vmem>>, vector<1x32x8xf32>
    %145 = vector.shape_cast %144 : vector<1x32x8xf32> to vector<32x8xf32>
    %cst_147 = arith.constant dense<0.000000e+00> : vector<4x8xf32>
    %146 = tpu.matmul %128, %145, %cst_147 {dimension_numbers = #tpu.dot_dimension_numbers<[1], [0], [0], [1], [0, 0, 1, 1], [], []>} : vector<4x32xf32>, vector<32x8xf32>, vector<4x8xf32> -> vector<4x8xf32>
    %c2_148 = arith.constant 2 : index
    %c0_149 = arith.constant 0 : index
    %c0_150 = arith.constant 0 : index
    %147 = vector.load %arg4[%c2_148, %c0_149, %c0_150] : memref<4x8x4xf32, #tpu.memory_space<vmem>>, vector<1x8x4xf32>
    %148 = vector.shape_cast %147 : vector<1x8x4xf32> to vector<8x4xf32>
    %cst_151 = arith.constant dense<0.000000e+00> : vector<8x8xf32>
    %149 = tpu.matmul %148, %146, %cst_151 {dimension_numbers = #tpu.dot_dimension_numbers<[1], [0], [0], [1], [0, 0, 1, 1], [], []>} : vector<8x4xf32>, vector<4x8xf32>, vector<8x8xf32> -> vector<8x8xf32>
    %150 = arith.addf %143, %149 : vector<8x8xf32>
    %c3_152 = arith.constant 3 : index
    %c0_153 = arith.constant 0 : index
    %c0_154 = arith.constant 0 : index
    %151 = vector.load %arg3[%c3_152, %c0_153, %c0_154] : memref<4x32x8xf32, #tpu.memory_space<vmem>>, vector<1x32x8xf32>
    %152 = vector.shape_cast %151 : vector<1x32x8xf32> to vector<32x8xf32>
    %cst_155 = arith.constant dense<0.000000e+00> : vector<4x8xf32>
    %153 = tpu.matmul %128, %152, %cst_155 {dimension_numbers = #tpu.dot_dimension_numbers<[1], [0], [0], [1], [0, 0, 1, 1], [], []>} : vector<4x32xf32>, vector<32x8xf32>, vector<4x8xf32> -> vector<4x8xf32>
    %c3_156 = arith.constant 3 : index
    %c0_157 = arith.constant 0 : index
    %c0_158 = arith.constant 0 : index
    %154 = vector.load %arg4[%c3_156, %c0_157, %c0_158] : memref<4x8x4xf32, #tpu.memory_space<vmem>>, vector<1x8x4xf32>
    %155 = vector.shape_cast %154 : vector<1x8x4xf32> to vector<8x4xf32>
    %cst_159 = arith.constant dense<0.000000e+00> : vector<8x8xf32>
    %156 = tpu.matmul %155, %153, %cst_159 {dimension_numbers = #tpu.dot_dimension_numbers<[1], [0], [0], [1], [0, 0, 1, 1], [], []>} : vector<8x4xf32>, vector<4x8xf32>, vector<8x8xf32> -> vector<8x8xf32>
    %157 = arith.addf %150, %156 : vector<8x8xf32>
    %158 = vector.broadcast %0 : vector<8x1xf32> to vector<8x8xf32>
    %159 = arith.addf %157, %158 : vector<8x8xf32>
    %160 = arith.negf %159 : vector<8x8xf32>
    %161 = math.exp %160 : vector<8x8xf32>
    %cst_160 = arith.constant 1.000000e+00 : f32
    %162 = vector.broadcast %cst_160 : f32 to vector<8x8xf32>
    %163 = arith.addf %162, %161 : vector<8x8xf32>
    %164 = arith.divf %162, %163 : vector<8x8xf32>
    %165 = arith.mulf %159, %164 : vector<8x8xf32>
    %c0_161 = arith.constant 0 : index
    %c0_162 = arith.constant 0 : index
    %c3_163 = arith.constant 3 : index
    %c0_164 = arith.constant 0 : index
    %166 = vector.load %arg6[%c0_161, %c0_162, %c3_163, %c0_164] : memref<1x8x8x8xf32, #tpu.memory_space<vmem>>, vector<1x8x1x8xf32>
    %167 = vector.shape_cast %166 : vector<1x8x1x8xf32> to vector<8x8xf32>
    %168 = vector.shape_cast %165 : vector<8x8xf32> to vector<1x8x1x8xf32>
    tpu.vector_store %arg6[%c0_161, %c0_162, %c3_163, %c0_164], %168 {strides = array<i32>} : memref<1x8x8x8xf32, #tpu.memory_space<vmem>>, vector<1x8x1x8xf32>,
    %c0_165 = arith.constant 0 : index
    %c0_166 = arith.constant 0 : index
    %c4 = arith.constant 4 : index
    %c0_167 = arith.constant 0 : index
    %169 = vector.load %arg2[%c0_165, %c0_166, %c4, %c0_167] : memref<1x4x8x32xf32, #tpu.memory_space<vmem>>, vector<1x4x1x32xf32>
    %170 = vector.shape_cast %169 : vector<1x4x1x32xf32> to vector<4x32xf32>
    %cst_168 = arith.constant 0.000000e+00 : f32
    %171 = vector.broadcast %cst_168 : f32 to vector<8x8xf32>
    %c0_169 = arith.constant 0 : index
    %c0_170 = arith.constant 0 : index
    %c0_171 = arith.constant 0 : index
    %172 = vector.load %arg3[%c0_169, %c0_170, %c0_171] : memref<4x32x8xf32, #tpu.memory_space<vmem>>, vector<1x32x8xf32>
    %173 = vector.shape_cast %172 : vector<1x32x8xf32> to vector<32x8xf32>
    %cst_172 = arith.constant dense<0.000000e+00> : vector<4x8xf32>
    %174 = tpu.matmul %170, %173, %cst_172 {dimension_numbers = #tpu.dot_dimension_numbers<[1], [0], [0], [1], [0, 0, 1, 1], [], []>} : vector<4x32xf32>, vector<32x8xf32>, vector<4x8xf32> -> vector<4x8xf32>
    %c0_173 = arith.constant 0 : index
    %c0_174 = arith.constant 0 : index
    %c0_175 = arith.constant 0 : index
    %175 = vector.load %arg4[%c0_173, %c0_174, %c0_175] : memref<4x8x4xf32, #tpu.memory_space<vmem>>, vector<1x8x4xf32>
    %176 = vector.shape_cast %175 : vector<1x8x4xf32> to vector<8x4xf32>
    %cst_176 = arith.constant dense<0.000000e+00> : vector<8x8xf32>
    %177 = tpu.matmul %176, %174, %cst_176 {dimension_numbers = #tpu.dot_dimension_numbers<[1], [0], [0], [1], [0, 0, 1, 1], [], []>} : vector<8x4xf32>, vector<4x8xf32>, vector<8x8xf32> -> vector<8x8xf32>
    %178 = arith.addf %171, %177 : vector<8x8xf32>
    %c1_177 = arith.constant 1 : index
    %c0_178 = arith.constant 0 : index
    %c0_179 = arith.constant 0 : index
    %179 = vector.load %arg3[%c1_177, %c0_178, %c0_179] : memref<4x32x8xf32, #tpu.memory_space<vmem>>, vector<1x32x8xf32>
    %180 = vector.shape_cast %179 : vector<1x32x8xf32> to vector<32x8xf32>
    %cst_180 = arith.constant dense<0.000000e+00> : vector<4x8xf32>
    %181 = tpu.matmul %170, %180, %cst_180 {dimension_numbers = #tpu.dot_dimension_numbers<[1], [0], [0], [1], [0, 0, 1, 1], [], []>} : vector<4x32xf32>, vector<32x8xf32>, vector<4x8xf32> -> vector<4x8xf32>
    %c1_181 = arith.constant 1 : index
    %c0_182 = arith.constant 0 : index
    %c0_183 = arith.constant 0 : index
    %182 = vector.load %arg4[%c1_181, %c0_182, %c0_183] : memref<4x8x4xf32, #tpu.memory_space<vmem>>, vector<1x8x4xf32>
    %183 = vector.shape_cast %182 : vector<1x8x4xf32> to vector<8x4xf32>
    %cst_184 = arith.constant dense<0.000000e+00> : vector<8x8xf32>
    %184 = tpu.matmul %183, %181, %cst_184 {dimension_numbers = #tpu.dot_dimension_numbers<[1], [0], [0], [1], [0, 0, 1, 1], [], []>} : vector<8x4xf32>, vector<4x8xf32>, vector<8x8xf32> -> vector<8x8xf32>
    %185 = arith.addf %178, %184 : vector<8x8xf32>
    %c2_185 = arith.constant 2 : index
    %c0_186 = arith.constant 0 : index
    %c0_187 = arith.constant 0 : index
    %186 = vector.load %arg3[%c2_185, %c0_186, %c0_187] : memref<4x32x8xf32, #tpu.memory_space<vmem>>, vector<1x32x8xf32>
    %187 = vector.shape_cast %186 : vector<1x32x8xf32> to vector<32x8xf32>
    %cst_188 = arith.constant dense<0.000000e+00> : vector<4x8xf32>
    %188 = tpu.matmul %170, %187, %cst_188 {dimension_numbers = #tpu.dot_dimension_numbers<[1], [0], [0], [1], [0, 0, 1, 1], [], []>} : vector<4x32xf32>, vector<32x8xf32>, vector<4x8xf32> -> vector<4x8xf32>
    %c2_189 = arith.constant 2 : index
    %c0_190 = arith.constant 0 : index
    %c0_191 = arith.constant 0 : index
    %189 = vector.load %arg4[%c2_189, %c0_190, %c0_191] : memref<4x8x4xf32, #tpu.memory_space<vmem>>, vector<1x8x4xf32>
    %190 = vector.shape_cast %189 : vector<1x8x4xf32> to vector<8x4xf32>
    %cst_192 = arith.constant dense<0.000000e+00> : vector<8x8xf32>
    %191 = tpu.matmul %190, %188, %cst_192 {dimension_numbers = #tpu.dot_dimension_numbers<[1], [0], [0], [1], [0, 0, 1, 1], [], []>} : vector<8x4xf32>, vector<4x8xf32>, vector<8x8xf32> -> vector<8x8xf32>
    %192 = arith.addf %185, %191 : vector<8x8xf32>
    %c3_193 = arith.constant 3 : index
    %c0_194 = arith.constant 0 : index
    %c0_195 = arith.constant 0 : index
    %193 = vector.load %arg3[%c3_193, %c0_194, %c0_195] : memref<4x32x8xf32, #tpu.memory_space<vmem>>, vector<1x32x8xf32>
    %194 = vector.shape_cast %193 : vector<1x32x8xf32> to vector<32x8xf32>
    %cst_196 = arith.constant dense<0.000000e+00> : vector<4x8xf32>
    %195 = tpu.matmul %170, %194, %cst_196 {dimension_numbers = #tpu.dot_dimension_numbers<[1], [0], [0], [1], [0, 0, 1, 1], [], []>} : vector<4x32xf32>, vector<32x8xf32>, vector<4x8xf32> -> vector<4x8xf32>
    %c3_197 = arith.constant 3 : index
    %c0_198 = arith.constant 0 : index
    %c0_199 = arith.constant 0 : index
    %196 = vector.load %arg4[%c3_197, %c0_198, %c0_199] : memref<4x8x4xf32, #tpu.memory_space<vmem>>, vector<1x8x4xf32>
    %197 = vector.shape_cast %196 : vector<1x8x4xf32> to vector<8x4xf32>
    %cst_200 = arith.constant dense<0.000000e+00> : vector<8x8xf32>
    %198 = tpu.matmul %197, %195, %cst_200 {dimension_numbers = #tpu.dot_dimension_numbers<[1], [0], [0], [1], [0, 0, 1, 1], [], []>} : vector<8x4xf32>, vector<4x8xf32>, vector<8x8xf32> -> vector<8x8xf32>
    %199 = arith.addf %192, %198 : vector<8x8xf32>
    %200 = vector.broadcast %0 : vector<8x1xf32> to vector<8x8xf32>
    %201 = arith.addf %199, %200 : vector<8x8xf32>
    %202 = arith.negf %201 : vector<8x8xf32>
    %203 = math.exp %202 : vector<8x8xf32>
    %cst_201 = arith.constant 1.000000e+00 : f32
    %204 = vector.broadcast %cst_201 : f32 to vector<8x8xf32>
    %205 = arith.addf %204, %203 : vector<8x8xf32>
    %206 = arith.divf %204, %205 : vector<8x8xf32>
    %207 = arith.mulf %201, %206 : vector<8x8xf32>
    %c0_202 = arith.constant 0 : index
    %c0_203 = arith.constant 0 : index
    %c4_204 = arith.constant 4 : index
    %c0_205 = arith.constant 0 : index
    %208 = vector.load %arg6[%c0_202, %c0_203, %c4_204, %c0_205] : memref<1x8x8x8xf32, #tpu.memory_space<vmem>>, vector<1x8x1x8xf32>
    %209 = vector.shape_cast %208 : vector<1x8x1x8xf32> to vector<8x8xf32>
    %210 = vector.shape_cast %207 : vector<8x8xf32> to vector<1x8x1x8xf32>
    tpu.vector_store %arg6[%c0_202, %c0_203, %c4_204, %c0_205], %210 {strides = array<i32>} : memref<1x8x8x8xf32, #tpu.memory_space<vmem>>, vector<1x8x1x8xf32>,
    %c0_206 = arith.constant 0 : index
    %c0_207 = arith.constant 0 : index
    %c5 = arith.constant 5 : index
    %c0_208 = arith.constant 0 : index
    %211 = vector.load %arg2[%c0_206, %c0_207, %c5, %c0_208] : memref<1x4x8x32xf32, #tpu.memory_space<vmem>>, vector<1x4x1x32xf32>
    %212 = vector.shape_cast %211 : vector<1x4x1x32xf32> to vector<4x32xf32>
    %cst_209 = arith.constant 0.000000e+00 : f32
    %213 = vector.broadcast %cst_209 : f32 to vector<8x8xf32>
    %c0_210 = arith.constant 0 : index
    %c0_211 = arith.constant 0 : index
    %c0_212 = arith.constant 0 : index
    %214 = vector.load %arg3[%c0_210, %c0_211, %c0_212] : memref<4x32x8xf32, #tpu.memory_space<vmem>>, vector<1x32x8xf32>
    %215 = vector.shape_cast %214 : vector<1x32x8xf32> to vector<32x8xf32>
    %cst_213 = arith.constant dense<0.000000e+00> : vector<4x8xf32>
    %216 = tpu.matmul %212, %215, %cst_213 {dimension_numbers = #tpu.dot_dimension_numbers<[1], [0], [0], [1], [0, 0, 1, 1], [], []>} : vector<4x32xf32>, vector<32x8xf32>, vector<4x8xf32> -> vector<4x8xf32>
    %c0_214 = arith.constant 0 : index
    %c0_215 = arith.constant 0 : index
    %c0_216 = arith.constant 0 : index
    %217 = vector.load %arg4[%c0_214, %c0_215, %c0_216] : memref<4x8x4xf32, #tpu.memory_space<vmem>>, vector<1x8x4xf32>
    %218 = vector.shape_cast %217 : vector<1x8x4xf32> to vector<8x4xf32>
    %cst_217 = arith.constant dense<0.000000e+00> : vector<8x8xf32>
    %219 = tpu.matmul %218, %216, %cst_217 {dimension_numbers = #tpu.dot_dimension_numbers<[1], [0], [0], [1], [0, 0, 1, 1], [], []>} : vector<8x4xf32>, vector<4x8xf32>, vector<8x8xf32> -> vector<8x8xf32>
    %220 = arith.addf %213, %219 : vector<8x8xf32>
    %c1_218 = arith.constant 1 : index
    %c0_219 = arith.constant 0 : index
    %c0_220 = arith.constant 0 : index
    %221 = vector.load %arg3[%c1_218, %c0_219, %c0_220] : memref<4x32x8xf32, #tpu.memory_space<vmem>>, vector<1x32x8xf32>
    %222 = vector.shape_cast %221 : vector<1x32x8xf32> to vector<32x8xf32>
    %cst_221 = arith.constant dense<0.000000e+00> : vector<4x8xf32>
    %223 = tpu.matmul %212, %222, %cst_221 {dimension_numbers = #tpu.dot_dimension_numbers<[1], [0], [0], [1], [0, 0, 1, 1], [], []>} : vector<4x32xf32>, vector<32x8xf32>, vector<4x8xf32> -> vector<4x8xf32>
    %c1_222 = arith.constant 1 : index
    %c0_223 = arith.constant 0 : index
    %c0_224 = arith.constant 0 : index
    %224 = vector.load %arg4[%c1_222, %c0_223, %c0_224] : memref<4x8x4xf32, #tpu.memory_space<vmem>>, vector<1x8x4xf32>
    %225 = vector.shape_cast %224 : vector<1x8x4xf32> to vector<8x4xf32>
    %cst_225 = arith.constant dense<0.000000e+00> : vector<8x8xf32>
    %226 = tpu.matmul %225, %223, %cst_225 {dimension_numbers = #tpu.dot_dimension_numbers<[1], [0], [0], [1], [0, 0, 1, 1], [], []>} : vector<8x4xf32>, vector<4x8xf32>, vector<8x8xf32> -> vector<8x8xf32>
    %227 = arith.addf %220, %226 : vector<8x8xf32>
    %c2_226 = arith.constant 2 : index
    %c0_227 = arith.constant 0 : index
    %c0_228 = arith.constant 0 : index
    %228 = vector.load %arg3[%c2_226, %c0_227, %c0_228] : memref<4x32x8xf32, #tpu.memory_space<vmem>>, vector<1x32x8xf32>
    %229 = vector.shape_cast %228 : vector<1x32x8xf32> to vector<32x8xf32>
    %cst_229 = arith.constant dense<0.000000e+00> : vector<4x8xf32>
    %230 = tpu.matmul %212, %229, %cst_229 {dimension_numbers = #tpu.dot_dimension_numbers<[1], [0], [0], [1], [0, 0, 1, 1], [], []>} : vector<4x32xf32>, vector<32x8xf32>, vector<4x8xf32> -> vector<4x8xf32>
    %c2_230 = arith.constant 2 : index
    %c0_231 = arith.constant 0 : index
    %c0_232 = arith.constant 0 : index
    %231 = vector.load %arg4[%c2_230, %c0_231, %c0_232] : memref<4x8x4xf32, #tpu.memory_space<vmem>>, vector<1x8x4xf32>
    %232 = vector.shape_cast %231 : vector<1x8x4xf32> to vector<8x4xf32>
    %cst_233 = arith.constant dense<0.000000e+00> : vector<8x8xf32>
    %233 = tpu.matmul %232, %230, %cst_233 {dimension_numbers = #tpu.dot_dimension_numbers<[1], [0], [0], [1], [0, 0, 1, 1], [], []>} : vector<8x4xf32>, vector<4x8xf32>, vector<8x8xf32> -> vector<8x8xf32>
    %234 = arith.addf %227, %233 : vector<8x8xf32>
    %c3_234 = arith.constant 3 : index
    %c0_235 = arith.constant 0 : index
    %c0_236 = arith.constant 0 : index
    %235 = vector.load %arg3[%c3_234, %c0_235, %c0_236] : memref<4x32x8xf32, #tpu.memory_space<vmem>>, vector<1x32x8xf32>
    %236 = vector.shape_cast %235 : vector<1x32x8xf32> to vector<32x8xf32>
    %cst_237 = arith.constant dense<0.000000e+00> : vector<4x8xf32>
    %237 = tpu.matmul %212, %236, %cst_237 {dimension_numbers = #tpu.dot_dimension_numbers<[1], [0], [0], [1], [0, 0, 1, 1], [], []>} : vector<4x32xf32>, vector<32x8xf32>, vector<4x8xf32> -> vector<4x8xf32>
    %c3_238 = arith.constant 3 : index
    %c0_239 = arith.constant 0 : index
    %c0_240 = arith.constant 0 : index
    %238 = vector.load %arg4[%c3_238, %c0_239, %c0_240] : memref<4x8x4xf32, #tpu.memory_space<vmem>>, vector<1x8x4xf32>
    %239 = vector.shape_cast %238 : vector<1x8x4xf32> to vector<8x4xf32>
    %cst_241 = arith.constant dense<0.000000e+00> : vector<8x8xf32>
    %240 = tpu.matmul %239, %237, %cst_241 {dimension_numbers = #tpu.dot_dimension_numbers<[1], [0], [0], [1], [0, 0, 1, 1], [], []>} : vector<8x4xf32>, vector<4x8xf32>, vector<8x8xf32> -> vector<8x8xf32>
    %241 = arith.addf %234, %240 : vector<8x8xf32>
    %242 = vector.broadcast %0 : vector<8x1xf32> to vector<8x8xf32>
    %243 = arith.addf %241, %242 : vector<8x8xf32>
    %244 = arith.negf %243 : vector<8x8xf32>
    %245 = math.exp %244 : vector<8x8xf32>
    %cst_242 = arith.constant 1.000000e+00 : f32
    %246 = vector.broadcast %cst_242 : f32 to vector<8x8xf32>
    %247 = arith.addf %246, %245 : vector<8x8xf32>
    %248 = arith.divf %246, %247 : vector<8x8xf32>
    %249 = arith.mulf %243, %248 : vector<8x8xf32>
    %c0_243 = arith.constant 0 : index
    %c0_244 = arith.constant 0 : index
    %c5_245 = arith.constant 5 : index
    %c0_246 = arith.constant 0 : index
    %250 = vector.load %arg6[%c0_243, %c0_244, %c5_245, %c0_246] : memref<1x8x8x8xf32, #tpu.memory_space<vmem>>, vector<1x8x1x8xf32>
    %251 = vector.shape_cast %250 : vector<1x8x1x8xf32> to vector<8x8xf32>
    %252 = vector.shape_cast %249 : vector<8x8xf32> to vector<1x8x1x8xf32>
    tpu.vector_store %arg6[%c0_243, %c0_244, %c5_245, %c0_246], %252 {strides = array<i32>} : memref<1x8x8x8xf32, #tpu.memory_space<vmem>>, vector<1x8x1x8xf32>,
    %c0_247 = arith.constant 0 : index
    %c0_248 = arith.constant 0 : index
    %c6 = arith.constant 6 : index
    %c0_249 = arith.constant 0 : index
    %253 = vector.load %arg2[%c0_247, %c0_248, %c6, %c0_249] : memref<1x4x8x32xf32, #tpu.memory_space<vmem>>, vector<1x4x1x32xf32>
    %254 = vector.shape_cast %253 : vector<1x4x1x32xf32> to vector<4x32xf32>
    %cst_250 = arith.constant 0.000000e+00 : f32
    %255 = vector.broadcast %cst_250 : f32 to vector<8x8xf32>
    %c0_251 = arith.constant 0 : index
    %c0_252 = arith.constant 0 : index
    %c0_253 = arith.constant 0 : index
    %256 = vector.load %arg3[%c0_251, %c0_252, %c0_253] : memref<4x32x8xf32, #tpu.memory_space<vmem>>, vector<1x32x8xf32>
    %257 = vector.shape_cast %256 : vector<1x32x8xf32> to vector<32x8xf32>
    %cst_254 = arith.constant dense<0.000000e+00> : vector<4x8xf32>
    %258 = tpu.matmul %254, %257, %cst_254 {dimension_numbers = #tpu.dot_dimension_numbers<[1], [0], [0], [1], [0, 0, 1, 1], [], []>} : vector<4x32xf32>, vector<32x8xf32>, vector<4x8xf32> -> vector<4x8xf32>
    %c0_255 = arith.constant 0 : index
    %c0_256 = arith.constant 0 : index
    %c0_257 = arith.constant 0 : index
    %259 = vector.load %arg4[%c0_255, %c0_256, %c0_257] : memref<4x8x4xf32, #tpu.memory_space<vmem>>, vector<1x8x4xf32>
    %260 = vector.shape_cast %259 : vector<1x8x4xf32> to vector<8x4xf32>
    %cst_258 = arith.constant dense<0.000000e+00> : vector<8x8xf32>
    %261 = tpu.matmul %260, %258, %cst_258 {dimension_numbers = #tpu.dot_dimension_numbers<[1], [0], [0], [1], [0, 0, 1, 1], [], []>} : vector<8x4xf32>, vector<4x8xf32>, vector<8x8xf32> -> vector<8x8xf32>
    %262 = arith.addf %255, %261 : vector<8x8xf32>
    %c1_259 = arith.constant 1 : index
    %c0_260 = arith.constant 0 : index
    %c0_261 = arith.constant 0 : index
    %263 = vector.load %arg3[%c1_259, %c0_260, %c0_261] : memref<4x32x8xf32, #tpu.memory_space<vmem>>, vector<1x32x8xf32>
    %264 = vector.shape_cast %263 : vector<1x32x8xf32> to vector<32x8xf32>
    %cst_262 = arith.constant dense<0.000000e+00> : vector<4x8xf32>
    %265 = tpu.matmul %254, %264, %cst_262 {dimension_numbers = #tpu.dot_dimension_numbers<[1], [0], [0], [1], [0, 0, 1, 1], [], []>} : vector<4x32xf32>, vector<32x8xf32>, vector<4x8xf32> -> vector<4x8xf32>
    %c1_263 = arith.constant 1 : index
    %c0_264 = arith.constant 0 : index
    %c0_265 = arith.constant 0 : index
    %266 = vector.load %arg4[%c1_263, %c0_264, %c0_265] : memref<4x8x4xf32, #tpu.memory_space<vmem>>, vector<1x8x4xf32>
    %267 = vector.shape_cast %266 : vector<1x8x4xf32> to vector<8x4xf32>
    %cst_266 = arith.constant dense<0.000000e+00> : vector<8x8xf32>
    %268 = tpu.matmul %267, %265, %cst_266 {dimension_numbers = #tpu.dot_dimension_numbers<[1], [0], [0], [1], [0, 0, 1, 1], [], []>} : vector<8x4xf32>, vector<4x8xf32>, vector<8x8xf32> -> vector<8x8xf32>
    %269 = arith.addf %262, %268 : vector<8x8xf32>
    %c2_267 = arith.constant 2 : index
    %c0_268 = arith.constant 0 : index
    %c0_269 = arith.constant 0 : index
    %270 = vector.load %arg3[%c2_267, %c0_268, %c0_269] : memref<4x32x8xf32, #tpu.memory_space<vmem>>, vector<1x32x8xf32>
    %271 = vector.shape_cast %270 : vector<1x32x8xf32> to vector<32x8xf32>
    %cst_270 = arith.constant dense<0.000000e+00> : vector<4x8xf32>
    %272 = tpu.matmul %254, %271, %cst_270 {dimension_numbers = #tpu.dot_dimension_numbers<[1], [0], [0], [1], [0, 0, 1, 1], [], []>} : vector<4x32xf32>, vector<32x8xf32>, vector<4x8xf32> -> vector<4x8xf32>
    %c2_271 = arith.constant 2 : index
    %c0_272 = arith.constant 0 : index
    %c0_273 = arith.constant 0 : index
    %273 = vector.load %arg4[%c2_271, %c0_272, %c0_273] : memref<4x8x4xf32, #tpu.memory_space<vmem>>, vector<1x8x4xf32>
    %274 = vector.shape_cast %273 : vector<1x8x4xf32> to vector<8x4xf32>
    %cst_274 = arith.constant dense<0.000000e+00> : vector<8x8xf32>
    %275 = tpu.matmul %274, %272, %cst_274 {dimension_numbers = #tpu.dot_dimension_numbers<[1], [0], [0], [1], [0, 0, 1, 1], [], []>} : vector<8x4xf32>, vector<4x8xf32>, vector<8x8xf32> -> vector<8x8xf32>
    %276 = arith.addf %269, %275 : vector<8x8xf32>
    %c3_275 = arith.constant 3 : index
    %c0_276 = arith.constant 0 : index
    %c0_277 = arith.constant 0 : index
    %277 = vector.load %arg3[%c3_275, %c0_276, %c0_277] : memref<4x32x8xf32, #tpu.memory_space<vmem>>, vector<1x32x8xf32>
    %278 = vector.shape_cast %277 : vector<1x32x8xf32> to vector<32x8xf32>
    %cst_278 = arith.constant dense<0.000000e+00> : vector<4x8xf32>
    %279 = tpu.matmul %254, %278, %cst_278 {dimension_numbers = #tpu.dot_dimension_numbers<[1], [0], [0], [1], [0, 0, 1, 1], [], []>} : vector<4x32xf32>, vector<32x8xf32>, vector<4x8xf32> -> vector<4x8xf32>
    %c3_279 = arith.constant 3 : index
    %c0_280 = arith.constant 0 : index
    %c0_281 = arith.constant 0 : index
    %280 = vector.load %arg4[%c3_279, %c0_280, %c0_281] : memref<4x8x4xf32, #tpu.memory_space<vmem>>, vector<1x8x4xf32>
    %281 = vector.shape_cast %280 : vector<1x8x4xf32> to vector<8x4xf32>
    %cst_282 = arith.constant dense<0.000000e+00> : vector<8x8xf32>
    %282 = tpu.matmul %281, %279, %cst_282 {dimension_numbers = #tpu.dot_dimension_numbers<[1], [0], [0], [1], [0, 0, 1, 1], [], []>} : vector<8x4xf32>, vector<4x8xf32>, vector<8x8xf32> -> vector<8x8xf32>
    %283 = arith.addf %276, %282 : vector<8x8xf32>
    %284 = vector.broadcast %0 : vector<8x1xf32> to vector<8x8xf32>
    %285 = arith.addf %283, %284 : vector<8x8xf32>
    %286 = arith.negf %285 : vector<8x8xf32>
    %287 = math.exp %286 : vector<8x8xf32>
    %cst_283 = arith.constant 1.000000e+00 : f32
    %288 = vector.broadcast %cst_283 : f32 to vector<8x8xf32>
    %289 = arith.addf %288, %287 : vector<8x8xf32>
    %290 = arith.divf %288, %289 : vector<8x8xf32>
    %291 = arith.mulf %285, %290 : vector<8x8xf32>
    %c0_284 = arith.constant 0 : index
    %c0_285 = arith.constant 0 : index
    %c6_286 = arith.constant 6 : index
    %c0_287 = arith.constant 0 : index
    %292 = vector.load %arg6[%c0_284, %c0_285, %c6_286, %c0_287] : memref<1x8x8x8xf32, #tpu.memory_space<vmem>>, vector<1x8x1x8xf32>
    %293 = vector.shape_cast %292 : vector<1x8x1x8xf32> to vector<8x8xf32>
    %294 = vector.shape_cast %291 : vector<8x8xf32> to vector<1x8x1x8xf32>
    tpu.vector_store %arg6[%c0_284, %c0_285, %c6_286, %c0_287], %294 {strides = array<i32>} : memref<1x8x8x8xf32, #tpu.memory_space<vmem>>, vector<1x8x1x8xf32>,
    %c0_288 = arith.constant 0 : index
    %c0_289 = arith.constant 0 : index
    %c7 = arith.constant 7 : index
    %c0_290 = arith.constant 0 : index
    %295 = vector.load %arg2[%c0_288, %c0_289, %c7, %c0_290] : memref<1x4x8x32xf32, #tpu.memory_space<vmem>>, vector<1x4x1x32xf32>
    %296 = vector.shape_cast %295 : vector<1x4x1x32xf32> to vector<4x32xf32>
    %cst_291 = arith.constant 0.000000e+00 : f32
    %297 = vector.broadcast %cst_291 : f32 to vector<8x8xf32>
    %c0_292 = arith.constant 0 : index
    %c0_293 = arith.constant 0 : index
    %c0_294 = arith.constant 0 : index
    %298 = vector.load %arg3[%c0_292, %c0_293, %c0_294] : memref<4x32x8xf32, #tpu.memory_space<vmem>>, vector<1x32x8xf32>
    %299 = vector.shape_cast %298 : vector<1x32x8xf32> to vector<32x8xf32>
    %cst_295 = arith.constant dense<0.000000e+00> : vector<4x8xf32>
    %300 = tpu.matmul %296, %299, %cst_295 {dimension_numbers = #tpu.dot_dimension_numbers<[1], [0], [0], [1], [0, 0, 1, 1], [], []>} : vector<4x32xf32>, vector<32x8xf32>, vector<4x8xf32> -> vector<4x8xf32>
    %c0_296 = arith.constant 0 : index
    %c0_297 = arith.constant 0 : index
    %c0_298 = arith.constant 0 : index
    %301 = vector.load %arg4[%c0_296, %c0_297, %c0_298] : memref<4x8x4xf32, #tpu.memory_space<vmem>>, vector<1x8x4xf32>
    %302 = vector.shape_cast %301 : vector<1x8x4xf32> to vector<8x4xf32>
    %cst_299 = arith.constant dense<0.000000e+00> : vector<8x8xf32>
    %303 = tpu.matmul %302, %300, %cst_299 {dimension_numbers = #tpu.dot_dimension_numbers<[1], [0], [0], [1], [0, 0, 1, 1], [], []>} : vector<8x4xf32>, vector<4x8xf32>, vector<8x8xf32> -> vector<8x8xf32>
    %304 = arith.addf %297, %303 : vector<8x8xf32>
    %c1_300 = arith.constant 1 : index
    %c0_301 = arith.constant 0 : index
    %c0_302 = arith.constant 0 : index
    %305 = vector.load %arg3[%c1_300, %c0_301, %c0_302] : memref<4x32x8xf32, #tpu.memory_space<vmem>>, vector<1x32x8xf32>
    %306 = vector.shape_cast %305 : vector<1x32x8xf32> to vector<32x8xf32>
    %cst_303 = arith.constant dense<0.000000e+00> : vector<4x8xf32>
    %307 = tpu.matmul %296, %306, %cst_303 {dimension_numbers = #tpu.dot_dimension_numbers<[1], [0], [0], [1], [0, 0, 1, 1], [], []>} : vector<4x32xf32>, vector<32x8xf32>, vector<4x8xf32> -> vector<4x8xf32>
    %c1_304 = arith.constant 1 : index
    %c0_305 = arith.constant 0 : index
    %c0_306 = arith.constant 0 : index
    %308 = vector.load %arg4[%c1_304, %c0_305, %c0_306] : memref<4x8x4xf32, #tpu.memory_space<vmem>>, vector<1x8x4xf32>
    %309 = vector.shape_cast %308 : vector<1x8x4xf32> to vector<8x4xf32>
    %cst_307 = arith.constant dense<0.000000e+00> : vector<8x8xf32>
    %310 = tpu.matmul %309, %307, %cst_307 {dimension_numbers = #tpu.dot_dimension_numbers<[1], [0], [0], [1], [0, 0, 1, 1], [], []>} : vector<8x4xf32>, vector<4x8xf32>, vector<8x8xf32> -> vector<8x8xf32>
    %311 = arith.addf %304, %310 : vector<8x8xf32>
    %c2_308 = arith.constant 2 : index
    %c0_309 = arith.constant 0 : index
    %c0_310 = arith.constant 0 : index
    %312 = vector.load %arg3[%c2_308, %c0_309, %c0_310] : memref<4x32x8xf32, #tpu.memory_space<vmem>>, vector<1x32x8xf32>
    %313 = vector.shape_cast %312 : vector<1x32x8xf32> to vector<32x8xf32>
    %cst_311 = arith.constant dense<0.000000e+00> : vector<4x8xf32>
    %314 = tpu.matmul %296, %313, %cst_311 {dimension_numbers = #tpu.dot_dimension_numbers<[1], [0], [0], [1], [0, 0, 1, 1], [], []>} : vector<4x32xf32>, vector<32x8xf32>, vector<4x8xf32> -> vector<4x8xf32>
    %c2_312 = arith.constant 2 : index
    %c0_313 = arith.constant 0 : index
    %c0_314 = arith.constant 0 : index
    %315 = vector.load %arg4[%c2_312, %c0_313, %c0_314] : memref<4x8x4xf32, #tpu.memory_space<vmem>>, vector<1x8x4xf32>
    %316 = vector.shape_cast %315 : vector<1x8x4xf32> to vector<8x4xf32>
    %cst_315 = arith.constant dense<0.000000e+00> : vector<8x8xf32>
    %317 = tpu.matmul %316, %314, %cst_315 {dimension_numbers = #tpu.dot_dimension_numbers<[1], [0], [0], [1], [0, 0, 1, 1], [], []>} : vector<8x4xf32>, vector<4x8xf32>, vector<8x8xf32> -> vector<8x8xf32>
    %318 = arith.addf %311, %317 : vector<8x8xf32>
    %c3_316 = arith.constant 3 : index
    %c0_317 = arith.constant 0 : index
    %c0_318 = arith.constant 0 : index
    %319 = vector.load %arg3[%c3_316, %c0_317, %c0_318] : memref<4x32x8xf32, #tpu.memory_space<vmem>>, vector<1x32x8xf32>
    %320 = vector.shape_cast %319 : vector<1x32x8xf32> to vector<32x8xf32>
    %cst_319 = arith.constant dense<0.000000e+00> : vector<4x8xf32>
    %321 = tpu.matmul %296, %320, %cst_319 {dimension_numbers = #tpu.dot_dimension_numbers<[1], [0], [0], [1], [0, 0, 1, 1], [], []>} : vector<4x32xf32>, vector<32x8xf32>, vector<4x8xf32> -> vector<4x8xf32>
    %c3_320 = arith.constant 3 : index
    %c0_321 = arith.constant 0 : index
    %c0_322 = arith.constant 0 : index
    %322 = vector.load %arg4[%c3_320, %c0_321, %c0_322] : memref<4x8x4xf32, #tpu.memory_space<vmem>>, vector<1x8x4xf32>
    %323 = vector.shape_cast %322 : vector<1x8x4xf32> to vector<8x4xf32>
    %cst_323 = arith.constant dense<0.000000e+00> : vector<8x8xf32>
    %324 = tpu.matmul %323, %321, %cst_323 {dimension_numbers = #tpu.dot_dimension_numbers<[1], [0], [0], [1], [0, 0, 1, 1], [], []>} : vector<8x4xf32>, vector<4x8xf32>, vector<8x8xf32> -> vector<8x8xf32>
    %325 = arith.addf %318, %324 : vector<8x8xf32>
    %326 = vector.broadcast %0 : vector<8x1xf32> to vector<8x8xf32>
    %327 = arith.addf %325, %326 : vector<8x8xf32>
    %328 = arith.negf %327 : vector<8x8xf32>
    %329 = math.exp %328 : vector<8x8xf32>
    %cst_324 = arith.constant 1.000000e+00 : f32
    %330 = vector.broadcast %cst_324 : f32 to vector<8x8xf32>
    %331 = arith.addf %330, %329 : vector<8x8xf32>
    %332 = arith.divf %330, %331 : vector<8x8xf32>
    %333 = arith.mulf %327, %332 : vector<8x8xf32>
    %c0_325 = arith.constant 0 : index
    %c0_326 = arith.constant 0 : index
    %c7_327 = arith.constant 7 : index
    %c0_328 = arith.constant 0 : index
    %334 = vector.load %arg6[%c0_325, %c0_326, %c7_327, %c0_328] : memref<1x8x8x8xf32, #tpu.memory_space<vmem>>, vector<1x8x1x8xf32>
    %335 = vector.shape_cast %334 : vector<1x8x1x8xf32> to vector<8x8xf32>
    %336 = vector.shape_cast %333 : vector<8x8xf32> to vector<1x8x1x8xf32>
    tpu.vector_store %arg6[%c0_325, %c0_326, %c7_327, %c0_328], %336 {strides = array<i32>} : memref<1x8x8x8xf32, #tpu.memory_space<vmem>>, vector<1x8x1x8xf32>,
    return
  }
  func.func @transform_0(%arg0: i32, %arg1: i32) -> (i32, i32, i32, i32) {
    %c0_i32 = arith.constant 0 : i32
    %c0_i32_0 = arith.constant 0 : i32
    %c0_i32_1 = arith.constant 0 : i32
    return %arg1, %c0_i32, %arg0, %c0_i32_0 : i32, i32, i32, i32
  }
  func.func @transform_1(%arg0: i32, %arg1: i32) -> (i32, i32, i32) {
    %c0_i32 = arith.constant 0 : i32
    %c0_i32_0 = arith.constant 0 : i32
    %c0_i32_1 = arith.constant 0 : i32
    %c0_i32_2 = arith.constant 0 : i32
    return %c0_i32, %c0_i32_0, %c0_i32_1 : i32, i32, i32
  }
  func.func @transform_2(%arg0: i32, %arg1: i32) -> (i32, i32, i32) {
    %c0_i32 = arith.constant 0 : i32
    %c0_i32_0 = arith.constant 0 : i32
    %c0_i32_1 = arith.constant 0 : i32
    %c0_i32_2 = arith.constant 0 : i32
    return %c0_i32, %c0_i32_0, %c0_i32_1 : i32, i32, i32
  }
  func.func @transform_3(%arg0: i32, %arg1: i32) -> (i32, i32) {
    %c0_i32 = arith.constant 0 : i32
    %c0_i32_0 = arith.constant 0 : i32
    %c0_i32_1 = arith.constant 0 : i32
    return %c0_i32, %c0_i32_0 : i32, i32
  }
  func.func @transform_4(%arg0: i32, %arg1: i32) -> (i32, i32, i32, i32) {
    %c0_i32 = arith.constant 0 : i32
    %c0_i32_0 = arith.constant 0 : i32
    %c0_i32_1 = arith.constant 0 : i32
    return %arg1, %c0_i32, %arg0, %c0_i32_0 : i32, i32, i32, i32
  }
}

</mosaic_0001>

<bundles_post_ra>
// kernel: focus_forward.1
= control target key start
LH: loop header
LB: loop body
LE: loop exit
PB: predicated region body
PF: predicated region fallthrough
CT: control target
= control target key end

     0   :  { %9 = vsyncpa [#allocation3], 0  ;;  %s8260_s0 = inlined_call_operand.vmem [shape: f32[2,4,8,32], index: 0, kind: input, shape index: {}]   ;;  %s8261_s1 = inlined_call_operand.vmem [shape: f32[4,32,8], index: 1, kind: input, shape index: {}]   ;;  %s8262_s2 = inlined_call_operand.vmem [shape: f32[4,8,4], index: 2, kind: input, shape index: {}]   ;;  %s8263_s3 = inlined_call_operand.vmem [shape: f32[8,1], index: 3, kind: input, shape index: {}]   ;;  %s8264_s4 = inlined_call_operand.hbm [shape: f32[2,8,8,8], index: 4, kind: output, shape index: {}]  }
   0x1   :  { %11 = vsyncpa [#allocation3 + $0x1], 0  ;;  %s7080_s15 = smov 0   ;;  %s7082_s16 = smov 0  }
   0x2   :  { %s7084_s17 = smov 0   ;;  %s7086_s18 = smov 0  }
   0x3   :  { %s7088_s19 = smov 0   ;;  %s7090_s20 = smov 0  }
   0x4 LB: > { %s5901_s21 = sadd.s32 4294967295, %s7046_s20   ;;  %s5902_s22 = sadd.s32 4294967294, %s7046_s20   ;;  %s7046_s20 = sphi %s7090_s20, %s17_s20   ;;  %s7042_s19 = sphi %s7088_s19, %s8271_s19   ;;  %s7038_s18 = sphi %s7086_s18, %s8270_s18   ;;  %s7034_s17 = sphi %s7084_s17, %s8269_s17   ;;  %s7030_s16 = sphi %s7082_s16, %s8268_s16   ;;  %s7026_s15 = sphi %s7080_s15, %s8267_s15  }
   0x5   : > { %s26_s23 = sadd.s32 1, %s7042_s19  ;;  %s129_s24 = sadd.s32 1, %s7034_s17 }
   0x6   : > { %p27_p0 = scmp.ge.s32.totalorder %s26_s23, 2  ;;  %p139_p1 = scmp.ne.s32.totalorder %s7034_s17, %s7030_s16 }
   0x7   : > { %p140_p2 = scmp.eq.s32.totalorder %s5901_s21, 1  ;;  %p145_p3 = scmp.ne.s32.totalorder %s7030_s16, %s7026_s15 }
   0x8   : > { %s8273_s23 = smov (%p27_p0, %s26_s23), 0  ;;  %p146_p5 = scmp.eq.s32.totalorder %s5902_s22, 1 }
   0x9   : > { %p7120_p4 = por %p140_p2, %p139_p1  ;;  %s124_s26 = ssub.s32 %s7042_s19, %s8273_s23 }
   0xa   : > { %p5905_p6 = scmp.ge.s32.totalorder %s7046_s20, 1  ;;  %p127_p7 = scmp.eq.s32.totalorder %s124_s26, 0 }
   0xb   : > { %p7127_p8 = por %p146_p5, %p145_p3  ;;  %p184_p9 = scmp.lt.s32.totalorder %s7046_s20, 3 }
   0xc   : > { %s7133_s28 = scalar_select %p127_p7, %s7034_s17, %s129_s24  }
   0xd   : > { %p185_p10 = pnand %p5905_p6, %p184_p9 }
   0xe   : > { %p213_p11 = scmp.lt.s32.totalorder (!%p185_p10), %s7038_s18, 1  ;;  %s210_s29 = sand.u32 (!%p185_p10), 1, %s7030_s16  }
   0xf   : > { %188 = sbr.rel (%p185_p10) target bundleno = 3796 (0xed4), region = 36  ;;  %s5906_s30 = sshll.u32 (!%p185_p10), %s210_s29, 6 }
  0x10   : > { %s7443_s5 = scalar_lea.vmem (!%p185_p10), [#allocation2], %s5906_s30  ;;  %s7052_s13 = smov (!%p185_p10), [#allocation2]  }
  0x11   : > { %s5823_s8 = sshll.u32 (!%p185_p10), %s7443_s5, 4  ;;  %s6974_s14 = sshll.u32 (!%p185_p10), %s7052_s13, 4  ;;  %s8203_s8 = int_to_ptr.vmem [resolvable:$true] %s5823_s8  ;;  %s6975_s14 = int_to_ptr.vmem [resolvable:$false] %s6974_s14 }
  0x12   : > { %s6970_s12 = scalar_lea.vmem (!%p185_p10), %s8203_s8, 1024  ;;  %s6976_s21 = scalar_lea.vmem (!%p185_p10), %s6975_s14, 2048 }
  0x13   : > { %p6971_p12 = scmp.ne.s32.totalorder (!%p185_p10), %s8203_s8, %s6970_s12  ;;  %p6977_p1 = scmp.lt.s32.totalorder (!%p185_p10), %s8203_s8, %s6975_s14 }
  0x14   : > { %v7138_v0 = vld [vmem:[%s8261_s1 + $0x38] sm:$0xff]  ;;  %v7048_v2 = vmov 0.0   ;;  %v7151_v3 = vld [vmem:[%s8261_s1 + $0x30] sm:$0xff]  ;;  %s214_s11 = scalar_select %p213_p11, %s7038_s18, 1  ;;  %v7166_v5 = vld [vmem:[%s8261_s1 + $0x28] sm:$0xff]  ;;  %vm235_vm0 = vcmask 1041409  }
  0x15   : > { %v7143_v1 = vld [vmem:[%s8261_s1 + $0x18] sm:$0xff]  ;;  %6375 = vmatprep.subr.mxu1 %v7048_v2  ;;  %6364 = vmatprep.subr.mxu0 %v7048_v2  ;;  %v7156_v4 = vld [vmem:[%s8261_s1 + $0x10] sm:$0xff]  ;;  %v7171_v6 = vld [vmem:[%s8261_s1 + $0x8] sm:$0xff]  ;;  %vm238_vm1 = vcmask 1042434   ;;  %vm7049_vm2 = vmmov 0   ;;  %vm241_vm3 = vcmask 1043459   ;;  %p6972_p13 = pnand %p6971_p12, %p7120_p4  ;;  %p6978_p2 = scmp.lt.s32.totalorder %s6976_s21, %s6970_s12 }
  0x16   : > { %6376 = vmatpush3.msra.mxu1 %v7138_v0  ;;  %6365 = vmatpush3.msra.mxu0 %v7143_v1  ;;  %s6138_s22 = sshll.u32 %s214_s11, 5  ;;  %v7180_v7 = vld [vmem:[%s8261_s1 + $0x20] sm:$0xff]  ;;  %vm243_vm4 = vcmask 261120   ;;  %vm398_vm5 = vcmask 1043456   ;;  %v7224_v19 = vld [vmem:[%s8262_s2 + $0x8] sm:$0xff]  ;;  %vm394_vm6 = vcmask 31744  }
  0x17   : > { %6377 = vmatprep.subr.mxu1 %v7048_v2  ;;  %6366 = vmatprep.subr.mxu0 %v7048_v2  ;;  %v7185_v8 = vld [vmem:[%s8261_s1] sm:$0xff]  ;;  %s7190_s7 = scalar_lea.vmem %s8260_s0, %s6138_s22  ;;  %v7234_v23 = vld [vmem:[%s8261_s1 + $0x58] sm:$0xff]  ;;  %v7244_v25 = vld [vmem:[%s8261_s1 + $0x50] sm:$0xff]  ;;  %v7050_v52 = vmov 0   ;;  %vm927_vm7 = vcmask 57344   ;;  %p6973_p0 = pneg %p6972_p13 }
  0x18   : > { %6378 = vmatpush3.msra.mxu1 %v7151_v3  ;;  %6367 = vmatpush3.msra.mxu0 %v7156_v4  ;;  %v222_v9 = vld [vmem:[%s7190_s7] sm:$0x1]  ;;  %v223_v10 = vld [vmem:[%s7190_s7 + $0x8] sm:$0x1]  ;;  %v224_v11 = vld [vmem:[%s7190_s7 + $0x10] sm:$0x1]  ;;  %p6979_p3 = por %p6978_p2, %p6977_p1 }
  0x19   : > { %6379 = vmatprep.subr.mxu1 %v7048_v2  ;;  %6368 = vmatprep.subr.mxu0 %v7048_v2  ;;  %v225_v12 = vld [vmem:[%s7190_s7 + $0x18] sm:$0x1]  ;;  %v234_v13 = vrot.slane %v223_v10, 7  ;;  %v237_v14 = vrot.slane %v224_v11, 6  ;;  %v7229_v22 = vld [vmem:[%s8262_s2] sm:$0xff]  ;;  %v7253_v27 = vld [vmem:[%s8261_s1 + $0x48] sm:$0xff] }
  0x1a   : > { %6380 = vmatpush3.msra.mxu1 %v7166_v5  ;;  %6369 = vmatpush3.msra.mxu0 %v7171_v6  ;;  %v240_v15 = vrot.slane %v225_v12, 5  ;;  %v7263_v28 = vld [vmem:[%s8261_s1 + $0x40] sm:$0xff]  ;;  %v7278_v34 = vld [vmem:[%s8262_s2 + $0x10] sm:$0xff]  ;;  %v7283_v36 = vld [vmem:[%s8261_s1 + $0x78] sm:$0xff]  ;;  %p6980_p5 = pnand %p6979_p3, %p6973_p0 }
  0x1b   : > { %6381 = vmatprep.subr.mxu1 %v7048_v2  ;;  %6370 = vmatprep.subr.mxu0 %v7048_v2  ;;  %v236_v16 = vsel %vm235_vm0, %v234_v13, %v222_v9  ;;  %v7292_v38 = vld [vmem:[%s8261_s1 + $0x70] sm:$0xff]  ;;  %v937_v39 = vld [vmem:[%s7190_s7 + $0x9] sm:$0x1]  ;;  %v7310_v43 = vld [vmem:[%s8261_s1 + $0x60] sm:$0xff] }
  0x1c   : > { %6382 = vmatpush3.msra.mxu1 %v7180_v7  ;;  %6383 = vmatprep.mubr.msk.f32.mxu1 %vm7049_vm2, %v7048_v2  ;;  %v239_v17 = vsel %vm238_vm1, %v237_v14, %v236_v16  ;;  %v7302_v40 = vld [vmem:[%s8261_s1 + $0x68] sm:$0xff]  ;;  %v938_v41 = vld [vmem:[%s7190_s7 + $0x11] sm:$0x1]  ;;  %v948_v42 = vrot.slane %v937_v39, 7  ;;  %v936_v44 = vld [vmem:[%s7190_s7 + $0x1] sm:$0x1] }
  0x1d   : > { %6371 = vmatpush3.msra.mxu0 %v7185_v8  ;;  %6372 = vmatprep.mubr.msk.f32.mxu0 %vm7049_vm2, %v7048_v2  ;;  %v7211_v18 = vsel %vm241_vm3, %v240_v15, %v239_v17  ;;  %v939_v45 = vld [vmem:[%s7190_s7 + $0x19] sm:$0x1]  ;;  %v950_v46 = vrot.slane %v938_v41, 6  ;;  %v221_v51 = vld [vmem:[%s8263_s3] sm:$0xff] }
  0x1e   : > { %6386 = vmatprep.subr.mxu0 %v7048_v2  ;;  %6391 = vmatprep.subr.mxu1 %v7048_v2  ;;  %v949_v47 = vsel %vm235_vm0, %v948_v42, %v936_v44  ;;  %v952_v48 = vrot.slane %v939_v45, 5  ;;  %v7345_v56 = vld [vmem:[%s8262_s2 + $0x18] sm:$0xff] }
  0x1f   : > { %6384 = vmatmul.mubr.msk.f32.vlgmr.msra.gmra.mxu1 %vm243_vm4, %v7211_v18  ;;  %6373 = vmatmul.mubr.msk.f32.vlgmr.msra.gmra.mxu0 %vm243_vm4, %v7211_v18  ;;  %v951_v49 = vsel %vm238_vm1, %v950_v46, %v949_v47 }
  0x20   : > { %6388 = vmatprep.mubr.msk.f32.mxu0 %vm7049_vm2, %v7048_v2  ;;  %6393 = vmatprep.mubr.msk.f32.mxu1 %vm7049_vm2, %v7048_v2  ;;  %v7330_v50 = vsel %vm241_vm3, %v952_v48, %v951_v49 }
  0x21   : > { %6937 = vset.pattern.permute.xlu0 %v7050_v52 }
  0x22   : > { %858 = vperm.xlu0 %6937, %v221_v51  }
  0x9d   : > { %v7383_v62 = vpop.permute.xlu0 %858 }
  0xdf   : > { %v388_v20 = vpop.f32.mrf.mxu1  ;;  %v312_v21 = vpop.f32.mrf.mxu0 }
  0xe0   : > { %6387 = vmatpush3.msk.msra.mxu0 %vm398_vm5, %v388_v20  ;;  %6392 = vmatpush3.msk.msra.mxu1 %vm398_vm5, %v312_v21  ;;  %v1633_v21 = vld [vmem:[%s7190_s7 + $0xa] sm:$0x1] }
  0xe1   : > { %v6385_v24 = vpop.f32.mrf.mxu1  ;;  %6389 = vmatmul.mubr.msk.f32.vlgmr.msra.gmra.mxu0 %vm394_vm6, %v7224_v19  ;;  %6396 = vmatprep.subr.mxu0 %v7048_v2  ;;  %v6374_v26 = vpop.f32.mrf.mxu0 }
  0xe2   : > { %6394 = vmatmul.mubr.msk.f32.vlgmr.msra.gmra.mxu1 %vm394_vm6, %v7229_v22  ;;  %6397 = vmatpush3.msra.mxu0 %v7234_v23  ;;  %v1634_v24 = vld [vmem:[%s7190_s7 + $0x12] sm:$0x1]  ;;  %v1644_v26 = vrot.slane %v1633_v21, 7 }
  0xe3   : > { %6398 = vmatprep.subr.mxu0 %v7048_v2  ;;  %6404 = vmatprep.mubr.msk.f32.mxu0 %vm7049_vm2, %v7048_v2 }
  0xe4   : > { %6399 = vmatpush3.msra.mxu0 %v7244_v25  ;;  %6407 = vmatprep.subr.mxu1 %v7048_v2 }
  0xe5   : > { %6400 = vmatprep.subr.mxu0 %v7048_v2  ;;  %6409 = vmatprep.mubr.msk.f32.mxu1 %vm7049_vm2, %v7048_v2 }
  0xe6   : > { %6401 = vmatpush3.msra.mxu0 %v7253_v27 }
  0xe7   : > { %6402 = vmatprep.subr.mxu0 %v7048_v2 }
  0xe8   : > { %6403 = vmatpush3.msra.mxu0 %v7263_v28 }
  0xe9   : > { %6405 = vmatmul.mubr.msk.f32.vlgmr.msra.gmra.mxu0 %vm243_vm4, %v7211_v18  ;;  %6423 = vmatprep.subr.mxu0 %v7048_v2 }
  0xea   : > { %6425 = vmatprep.mubr.msk.f32.mxu0 %vm7049_vm2, %v7048_v2 }
 0x1a1   : > { %v468_v29 = vpop.f32.mrf.mxu0 }
 0x1a2   : > { %v544_v30 = vpop.f32.mrf.mxu1 }
 0x1a3   : > { %v545_v31 = vadd.f32 %v544_v30, %v468_v29  ;;  %v6390_v32 = vpop.f32.mrf.mxu0  ;;  %v1632_v29 = vld [vmem:[%s7190_s7 + $0x2] sm:$0x1]  ;;  %v7051_v30 = vmov 1966171168  }
 0x1a4   : > { %v6395_v33 = vpop.f32.mrf.mxu1  ;;  %v874_v32 = vlaneseq }
 0x1a5   : > { %v1635_v33 = vld [vmem:[%s7190_s7 + $0x1a] sm:$0x1] }
 0x1a6   : > { %v875_v41 = vshrl.u32 %v874_v32, 7  ;;  %v1648_v42 = vrot.slane %v1635_v33, 5 }
 0x1a9   : > { %v619_v35 = vpop.f32.mrf.mxu0 }
 0x1aa   : > { %6408 = vmatpush3.msk.msra.mxu1 %vm398_vm5, %v619_v35  ;;  %v1646_v35 = vrot.slane %v1634_v24, 6 }
 0x1ab   : > { %v6406_v37 = vpop.f32.mrf.mxu0  ;;  %6410 = vmatmul.mubr.msk.f32.vlgmr.msra.gmra.mxu1 %vm394_vm6, %v7278_v34  ;;  %6412 = vmatprep.subr.mxu1 %v7048_v2 }
 0x1ac   : > { %6413 = vmatpush3.msra.mxu1 %v7283_v36  ;;  %6420 = vmatprep.mubr.msk.f32.mxu1 %vm7049_vm2, %v7048_v2  ;;  %v1645_v37 = vsel %vm235_vm0, %v1644_v26, %v1632_v29 }
 0x1ad   : > { %6414 = vmatprep.subr.mxu1 %v7048_v2  ;;  %v1647_v44 = vsel %vm238_vm1, %v1646_v35, %v1645_v37 }
 0x1ae   : > { %6415 = vmatpush3.msra.mxu1 %v7292_v38  ;;  %v7427_v46 = vsel %vm241_vm3, %v1648_v42, %v1647_v44  ;;  %v2329_v42 = vld [vmem:[%s7190_s7 + $0xb] sm:$0x1]  ;;  %v2330_v44 = vld [vmem:[%s7190_s7 + $0x13] sm:$0x1] }
 0x1af   : > { %6416 = vmatprep.subr.mxu1 %v7048_v2 }
 0x1b0   : > { %6417 = vmatpush3.msra.mxu1 %v7302_v40 }
 0x1b1   : > { %6418 = vmatprep.subr.mxu1 %v7048_v2 }
 0x1b2   : > { %6419 = vmatpush3.msra.mxu1 %v7310_v43 }
 0x1b3   : > { %6421 = vmatmul.mubr.msk.f32.vlgmr.msra.gmra.mxu1 %vm243_vm4, %v7211_v18  ;;  %6439 = vmatprep.subr.mxu1 %v7048_v2 }
 0x1b4   : > { %6440 = vmatpush3.msra.mxu1 %v7138_v0  ;;  %6447 = vmatprep.mubr.msk.f32.mxu1 %vm7049_vm2, %v7048_v2 }
 0x1b5   : > { %6441 = vmatprep.subr.mxu1 %v7048_v2 }
 0x1b6   : > { %6442 = vmatpush3.msra.mxu1 %v7151_v3 }
 0x1b7   : > { %6443 = vmatprep.subr.mxu1 %v7048_v2 }
 0x1b8   : > { %6444 = vmatpush3.msra.mxu1 %v7166_v5 }
 0x1b9   : > { %6445 = vmatprep.subr.mxu1 %v7048_v2 }
 0x1ba   : > { %6446 = vmatpush3.msra.mxu1 %v7180_v7 }
 0x1bb   : > { %6448 = vmatmul.mubr.msk.f32.vlgmr.msra.gmra.mxu1 %vm243_vm4, %v7330_v50  ;;  %6455 = vmatprep.subr.mxu1 %v7048_v2 }
 0x1bc   : > { %6457 = vmatprep.mubr.msk.f32.mxu1 %vm7049_vm2, %v7048_v2 }
 0x26b   : > { %v697_v53 = vpop.f32.mrf.mxu1 }
 0x26c   : > { %v701_v54 = vadd.f32 %v697_v53, %v545_v31  ;;  %v872_v31 = vunpack.c.l.s4 %v7051_v30 }
 0x26d   : > { %v6411_v55 = vpop.f32.mrf.mxu1 }
 0x26e   : > { %v873_v39 = vunpack.c.0.s8 %v872_v31 }
 0x270   : > { %v7423_v45 = vsub.s32 %v873_v39, %v875_v41 }
 0x273   : > { %v773_v57 = vpop.f32.mrf.mxu1 }
 0x274   : > { %6424 = vmatpush3.msk.msra.mxu0 %vm398_vm5, %v773_v57 }
 0x275   : > { %v6422_v58 = vpop.f32.mrf.mxu1  ;;  %6426 = vmatmul.mubr.msk.f32.vlgmr.msra.gmra.mxu0 %vm394_vm6, %v7345_v56  ;;  %6428 = vmatprep.subr.mxu0 %v7048_v2 }
 0x276   : > { %6429 = vmatpush3.msra.mxu0 %v7143_v1  ;;  %6436 = vmatprep.mubr.msk.f32.mxu0 %vm7049_vm2, %v7048_v2 }
 0x277   : > { %6430 = vmatprep.subr.mxu0 %v7048_v2 }
 0x278   : > { %6431 = vmatpush3.msra.mxu0 %v7156_v4 }
 0x279   : > { %6432 = vmatprep.subr.mxu0 %v7048_v2 }
 0x27a   : > { %6433 = vmatpush3.msra.mxu0 %v7171_v6 }
 0x27b   : > { %6434 = vmatprep.subr.mxu0 %v7048_v2  ;;  %v1097_v59 = vpop.f32.mrf.mxu1 }
 0x27c   : > { %6435 = vmatpush3.msra.mxu0 %v7185_v8 }
 0x27d   : > { %6437 = vmatmul.mubr.msk.f32.vlgmr.msra.gmra.mxu0 %vm243_vm4, %v7330_v50  ;;  %v6449_v60 = vpop.f32.mrf.mxu1  ;;  %6450 = vmatprep.subr.mxu0 %v7048_v2 }
 0x27e   : > { %6451 = vmatpush3.msk.msra.mxu0 %vm398_vm5, %v1097_v59  ;;  %6452 = vmatprep.mubr.msk.f32.mxu0 %vm7049_vm2, %v7048_v2 }
 0x27f   : > { %6460 = vmatprep.subr.mxu0 %v7048_v2 }
 0x281   : > { %6453 = vmatmul.mubr.msk.f32.vlgmr.msra.gmra.mxu0 %vm394_vm6, %v7224_v19 }
 0x282   : > { %6461 = vmatpush3.msra.mxu0 %v7234_v23  ;;  %6468 = vmatprep.mubr.msk.f32.mxu0 %vm7049_vm2, %v7048_v2 }
 0x283   : > { %6462 = vmatprep.subr.mxu0 %v7048_v2 }
 0x284   : > { %6463 = vmatpush3.msra.mxu0 %v7244_v25 }
 0x285   : > { %6464 = vmatprep.subr.mxu0 %v7048_v2 }
 0x286   : > { %6465 = vmatpush3.msra.mxu0 %v7253_v27 }
 0x287   : > { %6466 = vmatprep.subr.mxu0 %v7048_v2 }
 0x288   : > { %6467 = vmatpush3.msra.mxu0 %v7263_v28 }
 0x289   : > { %6469 = vmatmul.mubr.msk.f32.vlgmr.msra.gmra.mxu0 %vm243_vm4, %v7330_v50  ;;  %6487 = vmatprep.subr.mxu0 %v7048_v2 }
 0x28a   : > { %6489 = vmatprep.mubr.msk.f32.mxu0 %vm7049_vm2, %v7048_v2 }
 0x335   : > { %v851_v61 = vpop.f32.mrf.mxu0 }
 0x336   : > { %v855_v63 = vadd.f32 %v851_v61, %v701_v54 }
 0x337   : > { %v6427_v9 = vpop.f32.mrf.mxu0 }
 0x338   : > { %v861_v10 = vadd.f32 %v7383_v62, %v855_v63 }
 0x33a   : > { %v5936_v11 = vmul.f32 -1.442695, %v861_v10 }
 0x33c   : > { %6938 = vpow2.f32 %v5936_v11 }
 0x33d   : > { %v1022_v12 = vpop.f32.mrf.mxu0 }
 0x33e   : > { %6456 = vmatpush3.msk.msra.mxu1 %vm398_vm5, %v1022_v12 }
 0x33f   : > { %v6438_v13 = vpop.f32.mrf.mxu0  ;;  %6458 = vmatmul.mubr.msk.f32.vlgmr.msra.gmra.mxu1 %vm394_vm6, %v7229_v22  ;;  %6471 = vmatprep.subr.mxu1 %v7048_v2 }
 0x340   : > { %6473 = vmatprep.mubr.msk.f32.mxu1 %vm7049_vm2, %v7048_v2 }
 0x341   : > { %v7392_v14 = vpop.f32.mrf.mxu0 }
 0x343   : > { %v6454_v15 = vpop.f32.mrf.mxu0 }
 0x349   : > { %v6939_v16 = vpop.eup %6938  ;;  %v1324_v17 = vpop.f32.mrf.mxu0 }
 0x34a   : > { %v865_v18 = vadd.f32 1.0, %v6939_v16  ;;  %6472 = vmatpush3.msk.msra.mxu1 %vm398_vm5, %v1324_v17 }
 0x34b   : > { %v6470_v20 = vpop.f32.mrf.mxu0  ;;  %6474 = vmatmul.mubr.msk.f32.vlgmr.msra.gmra.mxu1 %vm394_vm6, %v7278_v34  ;;  %6476 = vmatprep.subr.mxu1 %v7048_v2 }
 0x34c   : > { %6940 = vrcp.f32 %v865_v18  ;;  %6477 = vmatpush3.msra.mxu1 %v7283_v36  ;;  %6484 = vmatprep.mubr.msk.f32.mxu1 %vm7049_vm2, %v7048_v2 }
 0x34d   : > { %6478 = vmatprep.subr.mxu1 %v7048_v2 }
 0x34e   : > { %6479 = vmatpush3.msra.mxu1 %v7292_v38 }
 0x34f   : > { %6480 = vmatprep.subr.mxu1 %v7048_v2 }
 0x350   : > { %6481 = vmatpush3.msra.mxu1 %v7302_v40 }
 0x351   : > { %6482 = vmatprep.subr.mxu1 %v7048_v2 }
 0x352   : > { %6483 = vmatpush3.msra.mxu1 %v7310_v43 }
 0x353   : > { %6485 = vmatmul.mubr.msk.f32.vlgmr.msra.gmra.mxu1 %vm243_vm4, %v7330_v50  ;;  %6503 = vmatprep.subr.mxu1 %v7048_v2 }
 0x354   : > { %6504 = vmatpush3.msra.mxu1 %v7138_v0  ;;  %6511 = vmatprep.mubr.msk.f32.mxu1 %vm7049_vm2, %v7048_v2 }
 0x355   : > { %6505 = vmatprep.subr.mxu1 %v7048_v2 }
 0x356   : > { %6506 = vmatpush3.msra.mxu1 %v7151_v3 }
 0x357   : > { %6507 = vmatprep.subr.mxu1 %v7048_v2 }
 0x358   : > { %6508 = vmatpush3.msra.mxu1 %v7166_v5 }
 0x359   : > { %v6941_v47 = vpop.eup %6940  ;;  %6509 = vmatprep.subr.mxu1 %v7048_v2 }
 0x35a   : > { %v868_v48 = vmul.f32 %v6941_v47, %v861_v10  ;;  %6510 = vmatpush3.msra.mxu1 %v7180_v7  ;;  %v2340_v47 = vrot.slane %v2329_v42, 7 }
 0x35b   : > { %6512 = vmatmul.mubr.msk.f32.vlgmr.msra.gmra.mxu1 %vm243_vm4, %v7427_v46  ;;  %6519 = vmatprep.subr.mxu1 %v7048_v2 }
 0x35c   : > { %v870_v49 = vcombine.high %v868_v48, %v868_v48  ;;  %v877_v50 = vrot.slane %v868_v48, %v7423_v45  ;;  %6521 = vmatprep.mubr.msk.f32.mxu1 %vm7049_vm2, %v7048_v2  ;;  %v2328_v48 = vld [vmem:[%s7190_s7 + $0x3] sm:$0x1] }
 0x35e   : > { %v884_v51 = vrot.slane %v870_v49, %v7423_v45  ;;  %v885_v52 = vcombine.high %v877_v50, %v877_v50  ;;  %v893_v53 = vrot.slane %v877_v50, %v7423_v45  ;;  %v2331_v49 = vld [vmem:[%s7190_s7 + $0x1b] sm:$0x1]  ;;  %v2342_v50 = vrot.slane %v2330_v44, 6 }
 0x360   : > { %v886_v54 = vcombine.high %v884_v51, %v884_v51  ;;  %v900_v55 = vrot.slane %v884_v51, %v7423_v45  ;;  %v907_v57 = vrot.slane %v885_v52, %v7423_v45  ;;  %v915_v58 = vcombine.high %v893_v53, %v893_v53  ;;  %928 = vst.msk [vmem:[%s7443_s5] sm:$0x1] %vm927_vm7, %v893_v53 }
 0x361   : > { %v2341_v51 = vsel %vm235_vm0, %v2340_v47, %v2328_v48  ;;  %v2344_v52 = vrot.slane %v2331_v49, 5  ;;  %v3026_v47 = vld [vmem:[%s7190_s7 + $0x14] sm:$0x1]  ;;  %v3024_v49 = vld [vmem:[%s7190_s7 + $0x4] sm:$0x1] }
 0x362   : > { %v914_v59 = vrot.slane %v886_v54, %v7423_v45  ;;  %v916_v60 = vcombine.high %v900_v55, %v900_v55  ;;  %v917_v61 = vcombine.high %v907_v57, %v907_v57  ;;  %929 = vst.msk [vmem:[%s7443_s5 + $0x8] sm:$0x1] %vm927_vm7, %v907_v57  ;;  %930 = vst.msk [vmem:[%s7443_s5 + $0x10] sm:$0x1] %vm927_vm7, %v915_v58 }
 0x363   : > { %932 = vst.msk [vmem:[%s7443_s5 + $0x20] sm:$0x1] %vm927_vm7, %v900_v55  ;;  %v2343_v53 = vsel %vm238_vm1, %v2342_v50, %v2341_v51  ;;  %v3038_v50 = vrot.slane %v3026_v47, 6  ;;  %v3720_v47 = vld [vmem:[%s7190_s7 + $0x5] sm:$0x1] }
 0x364   : > { %v918_v63 = vcombine.high %v914_v59, %v914_v59  ;;  %931 = vst.msk [vmem:[%s7443_s5 + $0x18] sm:$0x1] %vm927_vm7, %v917_v61  ;;  %933 = vst.msk [vmem:[%s7443_s5 + $0x28] sm:$0x1] %vm927_vm7, %v914_v59 }
 0x365   : > { %934 = vst.msk [vmem:[%s7443_s5 + $0x30] sm:$0x1] %vm927_vm7, %v916_v60 }
 0x366   : > { %935 = vst.msk [vmem:[%s7443_s5 + $0x38] sm:$0x1] %vm927_vm7, %v918_v63 }
 0x3ff   : > { %v1250_v9 = vpop.f32.mrf.mxu1 }
 0x400   : > { %v1251_v11 = vadd.f32 %v1250_v9, %v7392_v14 }
 0x401   : > { %v6459_v10 = vpop.f32.mrf.mxu1 }
 0x40b   : > { %v1401_v12 = vpop.f32.mrf.mxu1 }
 0x40c   : > { %v1405_v13 = vadd.f32 %v1401_v12, %v1251_v11 }
 0x40d   : > { %v6475_v15 = vpop.f32.mrf.mxu1 }
 0x413   : > { %v1476_v16 = vpop.f32.mrf.mxu1 }
 0x414   : > { %6488 = vmatpush3.msk.msra.mxu0 %vm398_vm5, %v1476_v16 }
 0x415   : > { %v6486_v17 = vpop.f32.mrf.mxu1  ;;  %6490 = vmatmul.mubr.msk.f32.vlgmr.msra.gmra.mxu0 %vm394_vm6, %v7345_v56  ;;  %6492 = vmatprep.subr.mxu0 %v7048_v2 }
 0x416   : > { %6493 = vmatpush3.msra.mxu0 %v7143_v1  ;;  %6500 = vmatprep.mubr.msk.f32.mxu0 %vm7049_vm2, %v7048_v2 }
 0x417   : > { %6494 = vmatprep.subr.mxu0 %v7048_v2 }
 0x418   : > { %6495 = vmatpush3.msra.mxu0 %v7156_v4 }
 0x419   : > { %6496 = vmatprep.subr.mxu0 %v7048_v2 }
 0x41a   : > { %6497 = vmatpush3.msra.mxu0 %v7171_v6 }
 0x41b   : > { %6498 = vmatprep.subr.mxu0 %v7048_v2  ;;  %v1793_v14 = vpop.f32.mrf.mxu1 }
 0x41c   : > { %6499 = vmatpush3.msra.mxu0 %v7185_v8 }
 0x41d   : > { %6501 = vmatmul.mubr.msk.f32.vlgmr.msra.gmra.mxu0 %vm243_vm4, %v7427_v46  ;;  %v6513_v18 = vpop.f32.mrf.mxu1  ;;  %6514 = vmatprep.subr.mxu0 %v7048_v2 }
 0x41e   : > { %6515 = vmatpush3.msk.msra.mxu0 %vm398_vm5, %v1793_v14  ;;  %6516 = vmatprep.mubr.msk.f32.mxu0 %vm7049_vm2, %v7048_v2 }
 0x41f   : > { %6524 = vmatprep.subr.mxu0 %v7048_v2 }
 0x421   : > { %6517 = vmatmul.mubr.msk.f32.vlgmr.msra.gmra.mxu0 %vm394_vm6, %v7224_v19 }
 0x422   : > { %6525 = vmatpush3.msra.mxu0 %v7234_v23  ;;  %6532 = vmatprep.mubr.msk.f32.mxu0 %vm7049_vm2, %v7048_v2 }
 0x423   : > { %6526 = vmatprep.subr.mxu0 %v7048_v2 }
 0x424   : > { %6527 = vmatpush3.msra.mxu0 %v7244_v25 }
 0x425   : > { %6528 = vmatprep.subr.mxu0 %v7048_v2 }
 0x426   : > { %6529 = vmatpush3.msra.mxu0 %v7253_v27 }
 0x427   : > { %6530 = vmatprep.subr.mxu0 %v7048_v2 }
 0x428   : > { %6531 = vmatpush3.msra.mxu0 %v7263_v28 }
 0x429   : > { %6533 = vmatmul.mubr.msk.f32.vlgmr.msra.gmra.mxu0 %vm243_vm4, %v7427_v46  ;;  %6551 = vmatprep.subr.mxu0 %v7048_v2 }
 0x42a   : > { %6553 = vmatprep.mubr.msk.f32.mxu0 %vm7049_vm2, %v7048_v2 }
 0x4d5   : > { %v1553_v20 = vpop.f32.mrf.mxu0 }
 0x4d6   : > { %v1557_v21 = vadd.f32 %v1553_v20, %v1405_v13 }
 0x4d7   : > { %v6491_v24 = vpop.f32.mrf.mxu0 }
 0x4d8   : > { %v1558_v26 = vadd.f32 %v1557_v21, %v7383_v62 }
 0x4da   : > { %v5964_v29 = vmul.f32 -1.442695, %v1558_v26 }
 0x4dc   : > { %6942 = vpow2.f32 %v5964_v29 }
 0x4dd   : > { %v1718_v30 = vpop.f32.mrf.mxu0 }
 0x4de   : > { %6520 = vmatpush3.msk.msra.mxu1 %vm398_vm5, %v1718_v30 }
 0x4df   : > { %v6502_v31 = vpop.f32.mrf.mxu0  ;;  %6522 = vmatmul.mubr.msk.f32.vlgmr.msra.gmra.mxu1 %vm394_vm6, %v7229_v22  ;;  %6535 = vmatprep.subr.mxu1 %v7048_v2 }
 0x4e0   : > { %6537 = vmatprep.mubr.msk.f32.mxu1 %vm7049_vm2, %v7048_v2 }
 0x4e1   : > { %v7506_v32 = vpop.f32.mrf.mxu0 }
 0x4e3   : > { %v6518_v33 = vpop.f32.mrf.mxu0 }
 0x4e9   : > { %v6943_v35 = vpop.eup %6942  ;;  %v2020_v37 = vpop.f32.mrf.mxu0 }
 0x4ea   : > { %v1562_v39 = vadd.f32 1.0, %v6943_v35  ;;  %6536 = vmatpush3.msk.msra.mxu1 %vm398_vm5, %v2020_v37 }
 0x4eb   : > { %v6534_v41 = vpop.f32.mrf.mxu0  ;;  %6538 = vmatmul.mubr.msk.f32.vlgmr.msra.gmra.mxu1 %vm394_vm6, %v7278_v34  ;;  %6540 = vmatprep.subr.mxu1 %v7048_v2 }
 0x4ec   : > { %6944 = vrcp.f32 %v1562_v39  ;;  %6541 = vmatpush3.msra.mxu1 %v7283_v36  ;;  %6548 = vmatprep.mubr.msk.f32.mxu1 %vm7049_vm2, %v7048_v2 }
 0x4ed   : > { %6542 = vmatprep.subr.mxu1 %v7048_v2 }
 0x4ee   : > { %6543 = vmatpush3.msra.mxu1 %v7292_v38 }
 0x4ef   : > { %6544 = vmatprep.subr.mxu1 %v7048_v2 }
 0x4f0   : > { %6545 = vmatpush3.msra.mxu1 %v7302_v40 }
 0x4f1   : > { %6546 = vmatprep.subr.mxu1 %v7048_v2 }
 0x4f2   : > { %6547 = vmatpush3.msra.mxu1 %v7310_v43 }
 0x4f3   : > { %6549 = vmatmul.mubr.msk.f32.vlgmr.msra.gmra.mxu1 %vm243_vm4, %v7427_v46  ;;  %6567 = vmatprep.subr.mxu1 %v7048_v2  ;;  %v7538_v46 = vsel %vm241_vm3, %v2344_v52, %v2343_v53 }
 0x4f4   : > { %6568 = vmatpush3.msra.mxu1 %v7138_v0  ;;  %6575 = vmatprep.mubr.msk.f32.mxu1 %vm7049_vm2, %v7048_v2 }
 0x4f5   : > { %6569 = vmatprep.subr.mxu1 %v7048_v2 }
 0x4f6   : > { %6570 = vmatpush3.msra.mxu1 %v7151_v3 }
 0x4f7   : > { %6571 = vmatprep.subr.mxu1 %v7048_v2 }
 0x4f8   : > { %6572 = vmatpush3.msra.mxu1 %v7166_v5 }
 0x4f9   : > { %v6945_v54 = vpop.eup %6944  ;;  %6573 = vmatprep.subr.mxu1 %v7048_v2 }
 0x4fa   : > { %v1565_v55 = vmul.f32 %v6945_v54, %v1558_v26  ;;  %6574 = vmatpush3.msra.mxu1 %v7180_v7 }
 0x4fb   : > { %6576 = vmatmul.mubr.msk.f32.vlgmr.msra.gmra.mxu1 %vm243_vm4, %v7538_v46  ;;  %6583 = vmatprep.subr.mxu1 %v7048_v2 }
 0x4fc   : > { %v1567_v57 = vcombine.high %v1565_v55, %v1565_v55  ;;  %v1574_v58 = vrot.slane %v1565_v55, %v7423_v45  ;;  %6585 = vmatprep.mubr.msk.f32.mxu1 %vm7049_vm2, %v7048_v2 }
 0x4fe   : > { %v1581_v59 = vrot.slane %v1567_v57, %v7423_v45  ;;  %v1582_v60 = vcombine.high %v1574_v58, %v1574_v58  ;;  %v1590_v61 = vrot.slane %v1574_v58, %v7423_v45 }
 0x500   : > { %v1583_v63 = vcombine.high %v1581_v59, %v1581_v59  ;;  %v1597_v9 = vrot.slane %v1581_v59, %v7423_v45  ;;  %v1604_v10 = vrot.slane %v1582_v60, %v7423_v45  ;;  %v1612_v11 = vcombine.high %v1590_v61, %v1590_v61  ;;  %1624 = vst.msk [vmem:[%s7443_s5 + $0x1] sm:$0x1] %vm927_vm7, %v1590_v61 }
 0x502   : > { %v1611_v12 = vrot.slane %v1583_v63, %v7423_v45  ;;  %v1613_v13 = vcombine.high %v1597_v9, %v1597_v9  ;;  %v1614_v15 = vcombine.high %v1604_v10, %v1604_v10  ;;  %1625 = vst.msk [vmem:[%s7443_s5 + $0x9] sm:$0x1] %vm927_vm7, %v1604_v10  ;;  %1626 = vst.msk [vmem:[%s7443_s5 + $0x11] sm:$0x1] %vm927_vm7, %v1612_v11 }
 0x503   : > { %1628 = vst.msk [vmem:[%s7443_s5 + $0x21] sm:$0x1] %vm927_vm7, %v1597_v9 }
 0x504   : > { %v1615_v16 = vcombine.high %v1611_v12, %v1611_v12  ;;  %1627 = vst.msk [vmem:[%s7443_s5 + $0x19] sm:$0x1] %vm927_vm7, %v1614_v15  ;;  %1629 = vst.msk [vmem:[%s7443_s5 + $0x29] sm:$0x1] %vm927_vm7, %v1611_v12 }
 0x505   : > { %1630 = vst.msk [vmem:[%s7443_s5 + $0x31] sm:$0x1] %vm927_vm7, %v1613_v13 }
 0x506   : > { %1631 = vst.msk [vmem:[%s7443_s5 + $0x39] sm:$0x1] %vm927_vm7, %v1615_v16  ;;  %v7680_v16 = vld [vmem:[%s8261_s1 + $0x18] sm:$0xff] }
 0x59f   : > { %v1946_v17 = vpop.f32.mrf.mxu1 }
 0x5a0   : > { %v1947_v18 = vadd.f32 %v1946_v17, %v7506_v32 }
 0x5a1   : > { %v6523_v14 = vpop.f32.mrf.mxu1 }
 0x5a2   : > { %v7689_v14 = vld [vmem:[%s8261_s1 + $0x10] sm:$0xff] }
 0x5ab   : > { %v2097_v20 = vpop.f32.mrf.mxu1 }
 0x5ac   : > { %v2101_v21 = vadd.f32 %v2097_v20, %v1947_v18  ;;  %v7698_v18 = vld [vmem:[%s8261_s1 + $0x8] sm:$0xff] }
 0x5ad   : > { %v6539_v24 = vpop.f32.mrf.mxu1 }
 0x5ae   : > { %v7719_v24 = vld [vmem:[%s8262_s2 + $0x8] sm:$0xff] }
 0x5b3   : > { %v2172_v26 = vpop.f32.mrf.mxu1 }
 0x5b4   : > { %6552 = vmatpush3.msk.msra.mxu0 %vm398_vm5, %v2172_v26 }
 0x5b5   : > { %v6550_v29 = vpop.f32.mrf.mxu1  ;;  %6554 = vmatmul.mubr.msk.f32.vlgmr.msra.gmra.mxu0 %vm394_vm6, %v7345_v56  ;;  %6556 = vmatprep.subr.mxu0 %v7048_v2 }
 0x5b6   : > { %6557 = vmatpush3.msra.mxu0 %v7143_v1  ;;  %6564 = vmatprep.mubr.msk.f32.mxu0 %vm7049_vm2, %v7048_v2 }
 0x5b7   : > { %6558 = vmatprep.subr.mxu0 %v7048_v2 }
 0x5b8   : > { %6559 = vmatpush3.msra.mxu0 %v7156_v4 }
 0x5b9   : > { %6560 = vmatprep.subr.mxu0 %v7048_v2 }
 0x5ba   : > { %6561 = vmatpush3.msra.mxu0 %v7171_v6 }
 0x5bb   : > { %6562 = vmatprep.subr.mxu0 %v7048_v2  ;;  %v2489_v30 = vpop.f32.mrf.mxu1 }
 0x5bc   : > { %6563 = vmatpush3.msra.mxu0 %v7185_v8 }
 0x5bd   : > { %6565 = vmatmul.mubr.msk.f32.vlgmr.msra.gmra.mxu0 %vm243_vm4, %v7538_v46  ;;  %v6577_v1 = vpop.f32.mrf.mxu1  ;;  %6578 = vmatprep.subr.mxu0 %v7048_v2 }
 0x5be   : > { %6579 = vmatpush3.msk.msra.mxu0 %vm398_vm5, %v2489_v30  ;;  %6580 = vmatprep.mubr.msk.f32.mxu0 %vm7049_vm2, %v7048_v2 }
 0x5bf   : > { %6588 = vmatprep.subr.mxu0 %v7048_v2 }
 0x5c1   : > { %6581 = vmatmul.mubr.msk.f32.vlgmr.msra.gmra.mxu0 %vm394_vm6, %v7224_v19 }
 0x5c2   : > { %6589 = vmatpush3.msra.mxu0 %v7234_v23  ;;  %6596 = vmatprep.mubr.msk.f32.mxu0 %vm7049_vm2, %v7048_v2 }
 0x5c3   : > { %6590 = vmatprep.subr.mxu0 %v7048_v2 }
 0x5c4   : > { %6591 = vmatpush3.msra.mxu0 %v7244_v25 }
 0x5c5   : > { %6592 = vmatprep.subr.mxu0 %v7048_v2 }
 0x5c6   : > { %6593 = vmatpush3.msra.mxu0 %v7253_v27 }
 0x5c7   : > { %6594 = vmatprep.subr.mxu0 %v7048_v2 }
 0x5c8   : > { %6595 = vmatpush3.msra.mxu0 %v7263_v28 }
 0x5c9   : > { %6597 = vmatmul.mubr.msk.f32.vlgmr.msra.gmra.mxu0 %vm243_vm4, %v7538_v46  ;;  %6615 = vmatprep.subr.mxu0 %v7048_v2 }
 0x5ca   : > { %6617 = vmatprep.mubr.msk.f32.mxu0 %vm7049_vm2, %v7048_v2 }
 0x675   : > { %v2249_v4 = vpop.f32.mrf.mxu0 }
 0x676   : > { %v2253_v6 = vadd.f32 %v2249_v4, %v2101_v21 }
 0x677   : > { %v6555_v8 = vpop.f32.mrf.mxu0 }
 0x678   : > { %v2254_v19 = vadd.f32 %v2253_v6, %v7383_v62  ;;  %v7755_v8 = vld [vmem:[%s8262_s2 + $0x10] sm:$0xff] }
 0x67a   : > { %v5992_v31 = vmul.f32 -1.442695, %v2254_v19 }
 0x67c   : > { %6946 = vpow2.f32 %v5992_v31 }
 0x67d   : > { %v2414_v32 = vpop.f32.mrf.mxu0 }
 0x67e   : > { %6584 = vmatpush3.msk.msra.mxu1 %vm398_vm5, %v2414_v32  ;;  %v7760_v32 = vld [vmem:[%s8261_s1 + $0x78] sm:$0xff] }
 0x67f   : > { %v6566_v33 = vpop.f32.mrf.mxu0  ;;  %6586 = vmatmul.mubr.msk.f32.vlgmr.msra.gmra.mxu1 %vm394_vm6, %v7229_v22  ;;  %6599 = vmatprep.subr.mxu1 %v7048_v2  ;;  %v3025_v22 = vld [vmem:[%s7190_s7 + $0xc] sm:$0x1] }
 0x680   : > { %6601 = vmatprep.mubr.msk.f32.mxu1 %vm7049_vm2, %v7048_v2  ;;  %v3036_v48 = vrot.slane %v3025_v22, 7  ;;  %v7787_v22 = vld [vmem:[%s8261_s1 + $0x60] sm:$0xff] }
 0x681   : > { %v7613_v35 = vpop.f32.mrf.mxu0 }
 0x683   : > { %v6582_v37 = vpop.f32.mrf.mxu0 }
 0x684   : > { %v7769_v37 = vld [vmem:[%s8261_s1 + $0x70] sm:$0xff] }
 0x689   : > { %v6947_v39 = vpop.eup %6946  ;;  %v2716_v41 = vpop.f32.mrf.mxu0 }
 0x68a   : > { %v2258_v42 = vadd.f32 1.0, %v6947_v39  ;;  %6600 = vmatpush3.msk.msra.mxu1 %vm398_vm5, %v2716_v41  ;;  %v3721_v39 = vld [vmem:[%s7190_s7 + $0xd] sm:$0x1] }
 0x68b   : > { %v6598_v44 = vpop.f32.mrf.mxu0  ;;  %6602 = vmatmul.mubr.msk.f32.vlgmr.msra.gmra.mxu1 %vm394_vm6, %v7278_v34  ;;  %6604 = vmatprep.subr.mxu1 %v7048_v2  ;;  %v3027_v34 = vld [vmem:[%s7190_s7 + $0x1c] sm:$0x1]  ;;  %v7779_v41 = vld [vmem:[%s8261_s1 + $0x68] sm:$0xff] }
 0x68c   : > { %6948 = vrcp.f32 %v2258_v42  ;;  %6605 = vmatpush3.msra.mxu1 %v7283_v36  ;;  %6612 = vmatprep.mubr.msk.f32.mxu1 %vm7049_vm2, %v7048_v2  ;;  %v3037_v36 = vsel %vm235_vm0, %v3036_v48, %v3024_v49  ;;  %v3722_v42 = vld [vmem:[%s7190_s7 + $0x15] sm:$0x1]  ;;  %v3732_v44 = vrot.slane %v3721_v39, 7  ;;  %v7795_v48 = vld [vmem:[%s8261_s1 + $0x38] sm:$0xff] }
 0x68d   : > { %6606 = vmatprep.subr.mxu1 %v7048_v2  ;;  %v3723_v49 = vld [vmem:[%s7190_s7 + $0x1d] sm:$0x1] }
 0x68e   : > { %6607 = vmatpush3.msra.mxu1 %v7292_v38  ;;  %v3040_v38 = vrot.slane %v3027_v34, 5  ;;  %v3734_v34 = vrot.slane %v3722_v42, 6 }
 0x68f   : > { %6608 = vmatprep.subr.mxu1 %v7048_v2 }
 0x690   : > { %6609 = vmatpush3.msra.mxu1 %v7302_v40  ;;  %v3039_v40 = vsel %vm238_vm1, %v3038_v50, %v3037_v36  ;;  %v3733_v50 = vsel %vm235_vm0, %v3732_v44, %v3720_v47  ;;  %v7806_v36 = vld [vmem:[%s8261_s1 + $0x30] sm:$0xff] }
 0x691   : > { %6610 = vmatprep.subr.mxu1 %v7048_v2 }
 0x692   : > { %6611 = vmatpush3.msra.mxu1 %v7310_v43  ;;  %v7645_v43 = vsel %vm241_vm3, %v3040_v38, %v3039_v40  ;;  %v3736_v38 = vrot.slane %v3723_v49, 5  ;;  %v7815_v40 = vld [vmem:[%s8261_s1 + $0x28] sm:$0xff] }
 0x693   : > { %6613 = vmatmul.mubr.msk.f32.vlgmr.msra.gmra.mxu1 %vm243_vm4, %v7538_v46  ;;  %6631 = vmatprep.subr.mxu1 %v7048_v2 }
 0x694   : > { %6632 = vmatpush3.msra.mxu1 %v7138_v0  ;;  %6639 = vmatprep.mubr.msk.f32.mxu1 %vm7049_vm2, %v7048_v2 }
 0x695   : > { %6633 = vmatprep.subr.mxu1 %v7048_v2 }
 0x696   : > { %6634 = vmatpush3.msra.mxu1 %v7151_v3 }
 0x697   : > { %6635 = vmatprep.subr.mxu1 %v7048_v2 }
 0x698   : > { %6636 = vmatpush3.msra.mxu1 %v7166_v5 }
 0x699   : > { %v6949_v51 = vpop.eup %6948  ;;  %6637 = vmatprep.subr.mxu1 %v7048_v2 }
 0x69a   : > { %v2261_v0 = vmul.f32 %v6949_v51, %v2254_v19  ;;  %6638 = vmatpush3.msra.mxu1 %v7180_v7  ;;  %v7823_v51 = vld [vmem:[%s8261_s1 + $0x20] sm:$0xff] }
 0x69b   : > { %6640 = vmatmul.mubr.msk.f32.vlgmr.msra.gmra.mxu1 %vm243_vm4, %v7645_v43  ;;  %6647 = vmatprep.subr.mxu1 %v7048_v2 }
 0x69c   : > { %v2263_v3 = vcombine.high %v2261_v0, %v2261_v0  ;;  %v2270_v5 = vrot.slane %v2261_v0, %v7423_v45  ;;  %6649 = vmatprep.mubr.msk.f32.mxu1 %vm7049_vm2, %v7048_v2 }
 0x69e   : > { %v2277_v52 = vrot.slane %v2263_v3, %v7423_v45  ;;  %v2278_v53 = vcombine.high %v2270_v5, %v2270_v5  ;;  %v2286_v7 = vrot.slane %v2270_v5, %v7423_v45 }
 0x6a0   : > { %v2279_v46 = vcombine.high %v2277_v52, %v2277_v52  ;;  %v2293_v54 = vrot.slane %v2277_v52, %v7423_v45  ;;  %v2300_v55 = vrot.slane %v2278_v53, %v7423_v45  ;;  %v2308_v57 = vcombine.high %v2286_v7, %v2286_v7  ;;  %2320 = vst.msk [vmem:[%s7443_s5 + $0x2] sm:$0x1] %vm927_vm7, %v2286_v7 }
 0x6a2   : > { %v2307_v58 = vrot.slane %v2279_v46, %v7423_v45  ;;  %v2309_v59 = vcombine.high %v2293_v54, %v2293_v54  ;;  %v2310_v60 = vcombine.high %v2300_v55, %v2300_v55  ;;  %2321 = vst.msk [vmem:[%s7443_s5 + $0xa] sm:$0x1] %vm927_vm7, %v2300_v55  ;;  %2322 = vst.msk [vmem:[%s7443_s5 + $0x12] sm:$0x1] %vm927_vm7, %v2308_v57 }
 0x6a3   : > { %2324 = vst.msk [vmem:[%s7443_s5 + $0x22] sm:$0x1] %vm927_vm7, %v2293_v54 }
 0x6a4   : > { %v2311_v61 = vcombine.high %v2307_v58, %v2307_v58  ;;  %2323 = vst.msk [vmem:[%s7443_s5 + $0x1a] sm:$0x1] %vm927_vm7, %v2310_v60  ;;  %2325 = vst.msk [vmem:[%s7443_s5 + $0x2a] sm:$0x1] %vm927_vm7, %v2307_v58 }
 0x6a5   : > { %2326 = vst.msk [vmem:[%s7443_s5 + $0x32] sm:$0x1] %vm927_vm7, %v2309_v59 }
 0x6a6   : > { %2327 = vst.msk [vmem:[%s7443_s5 + $0x3a] sm:$0x1] %vm927_vm7, %v2311_v61 }
 0x73f   : > { %v2642_v63 = vpop.f32.mrf.mxu1 }
 0x740   : > { %v2643_v10 = vadd.f32 %v2642_v63, %v7613_v35 }
 0x741   : > { %v6587_v9 = vpop.f32.mrf.mxu1 }
 0x74b   : > { %v2793_v11 = vpop.f32.mrf.mxu1 }
 0x74c   : > { %v2797_v12 = vadd.f32 %v2793_v11, %v2643_v10 }
 0x74d   : > { %v6603_v13 = vpop.f32.mrf.mxu1 }
 0x753   : > { %v2868_v15 = vpop.f32.mrf.mxu1 }
 0x754   : > { %6616 = vmatpush3.msk.msra.mxu0 %vm398_vm5, %v2868_v15 }
 0x755   : > { %v6614_v17 = vpop.f32.mrf.mxu1  ;;  %6618 = vmatmul.mubr.msk.f32.vlgmr.msra.gmra.mxu0 %vm394_vm6, %v7345_v56  ;;  %6620 = vmatprep.subr.mxu0 %v7048_v2  ;;  %v7705_v56 = vld [vmem:[%s8261_s1] sm:$0xff] }
 0x756   : > { %6621 = vmatpush3.msra.mxu0 %v7680_v16  ;;  %6628 = vmatprep.mubr.msk.f32.mxu0 %vm7049_vm2, %v7048_v2 }
 0x757   : > { %6622 = vmatprep.subr.mxu0 %v7048_v2 }
 0x758   : > { %6623 = vmatpush3.msra.mxu0 %v7689_v14 }
 0x759   : > { %6624 = vmatprep.subr.mxu0 %v7048_v2 }
 0x75a   : > { %6625 = vmatpush3.msra.mxu0 %v7698_v18 }
 0x75b   : > { %6626 = vmatprep.subr.mxu0 %v7048_v2  ;;  %v3185_v20 = vpop.f32.mrf.mxu1 }
 0x75c   : > { %6627 = vmatpush3.msra.mxu0 %v7705_v56 }
 0x75d   : > { %6629 = vmatmul.mubr.msk.f32.vlgmr.msra.gmra.mxu0 %vm243_vm4, %v7645_v43  ;;  %v6641_v21 = vpop.f32.mrf.mxu1  ;;  %6642 = vmatprep.subr.mxu0 %v7048_v2 }
 0x75e   : > { %6643 = vmatpush3.msk.msra.mxu0 %vm398_vm5, %v3185_v20  ;;  %6644 = vmatprep.mubr.msk.f32.mxu0 %vm7049_vm2, %v7048_v2  ;;  %v7862_v20 = vld [vmem:[%s8262_s2 + $0x18] sm:$0xff] }
 0x75f   : > { %6652 = vmatprep.subr.mxu0 %v7048_v2 }
 0x761   : > { %6645 = vmatmul.mubr.msk.f32.vlgmr.msra.gmra.mxu0 %vm394_vm6, %v7719_v24 }
 0x762   : > { %6653 = vmatpush3.msra.mxu0 %v7234_v23  ;;  %6660 = vmatprep.mubr.msk.f32.mxu0 %vm7049_vm2, %v7048_v2 }
 0x763   : > { %6654 = vmatprep.subr.mxu0 %v7048_v2 }
 0x764   : > { %6655 = vmatpush3.msra.mxu0 %v7244_v25 }
 0x765   : > { %6656 = vmatprep.subr.mxu0 %v7048_v2 }
 0x766   : > { %6657 = vmatpush3.msra.mxu0 %v7253_v27  ;;  %v7742_v27 = vld [vmem:[%s8262_s2] sm:$0xff] }
 0x767   : > { %6658 = vmatprep.subr.mxu0 %v7048_v2 }
 0x768   : > { %6659 = vmatpush3.msra.mxu0 %v7263_v28 }
 0x769   : > { %6661 = vmatmul.mubr.msk.f32.vlgmr.msra.gmra.mxu0 %vm243_vm4, %v7645_v43  ;;  %6679 = vmatprep.subr.mxu0 %v7048_v2 }
 0x76a   : > { %6681 = vmatprep.mubr.msk.f32.mxu0 %vm7049_vm2, %v7048_v2 }
 0x815   : > { %v2945_v23 = vpop.f32.mrf.mxu0 }
 0x816   : > { %v2949_v26 = vadd.f32 %v2945_v23, %v2797_v12 }
 0x817   : > { %v6619_v29 = vpop.f32.mrf.mxu0 }
 0x818   : > { %v2950_v25 = vadd.f32 %v2949_v26, %v7383_v62 }
 0x81a   : > { %v6020_v30 = vmul.f32 -1.442695, %v2950_v25 }
 0x81c   : > { %6950 = vpow2.f32 %v6020_v30  ;;  %v7894_v30 = vld [vmem:[%s8261_s1 + $0x50] sm:$0xff] }
 0x81d   : > { %v3110_v28 = vpop.f32.mrf.mxu0 }
 0x81e   : > { %6648 = vmatpush3.msk.msra.mxu1 %vm398_vm5, %v3110_v28  ;;  %v7903_v28 = vld [vmem:[%s8261_s1 + $0x48] sm:$0xff] }
 0x81f   : > { %v6630_v1 = vpop.f32.mrf.mxu0  ;;  %6650 = vmatmul.mubr.msk.f32.vlgmr.msra.gmra.mxu1 %vm394_vm6, %v7742_v27  ;;  %6663 = vmatprep.subr.mxu1 %v7048_v2 }
 0x820   : > { %6665 = vmatprep.mubr.msk.f32.mxu1 %vm7049_vm2, %v7048_v2  ;;  %v7910_v1 = vld [vmem:[%s8261_s1 + $0x40] sm:$0xff] }
 0x821   : > { %v7750_v4 = vpop.f32.mrf.mxu0 }
 0x823   : > { %v6646_v6 = vpop.f32.mrf.mxu0 }
 0x829   : > { %v6951_v19 = vpop.eup %6950  ;;  %v3412_v31 = vpop.f32.mrf.mxu0 }
 0x82a   : > { %v2954_v33 = vadd.f32 1.0, %v6951_v19  ;;  %6664 = vmatpush3.msk.msra.mxu1 %vm398_vm5, %v3412_v31 }
 0x82b   : > { %v6662_v35 = vpop.f32.mrf.mxu0  ;;  %6666 = vmatmul.mubr.msk.f32.vlgmr.msra.gmra.mxu1 %vm394_vm6, %v7755_v8  ;;  %6668 = vmatprep.subr.mxu1 %v7048_v2 }
 0x82c   : > { %6952 = vrcp.f32 %v2954_v33  ;;  %6669 = vmatpush3.msra.mxu1 %v7760_v32  ;;  %6676 = vmatprep.mubr.msk.f32.mxu1 %vm7049_vm2, %v7048_v2 }
 0x82d   : > { %6670 = vmatprep.subr.mxu1 %v7048_v2 }
 0x82e   : > { %6671 = vmatpush3.msra.mxu1 %v7769_v37 }
 0x82f   : > { %6672 = vmatprep.subr.mxu1 %v7048_v2 }
 0x830   : > { %6673 = vmatpush3.msra.mxu1 %v7779_v41 }
 0x831   : > { %6674 = vmatprep.subr.mxu1 %v7048_v2 }
 0x832   : > { %6675 = vmatpush3.msra.mxu1 %v7787_v22 }
 0x833   : > { %6677 = vmatmul.mubr.msk.f32.vlgmr.msra.gmra.mxu1 %vm243_vm4, %v7645_v43  ;;  %6695 = vmatprep.subr.mxu1 %v7048_v2  ;;  %v3735_v43 = vsel %vm238_vm1, %v3734_v34, %v3733_v50 }
 0x834   : > { %6696 = vmatpush3.msra.mxu1 %v7795_v48  ;;  %6703 = vmatprep.mubr.msk.f32.mxu1 %vm7049_vm2, %v7048_v2  ;;  %v7827_v0 = vsel %vm241_vm3, %v3736_v38, %v3735_v43  ;;  %v4417_v38 = vld [vmem:[%s7190_s7 + $0xe] sm:$0x1]  ;;  %v4418_v43 = vld [vmem:[%s7190_s7 + $0x16] sm:$0x1] }
 0x835   : > { %6697 = vmatprep.subr.mxu1 %v7048_v2 }
 0x836   : > { %6698 = vmatpush3.msra.mxu1 %v7806_v36 }
 0x837   : > { %6699 = vmatprep.subr.mxu1 %v7048_v2 }
 0x838   : > { %6700 = vmatpush3.msra.mxu1 %v7815_v40 }
 0x839   : > { %v6953_v3 = vpop.eup %6952  ;;  %6701 = vmatprep.subr.mxu1 %v7048_v2 }
 0x83a   : > { %v2957_v5 = vmul.f32 %v6953_v3, %v2950_v25  ;;  %6702 = vmatpush3.msra.mxu1 %v7823_v51  ;;  %v7887_v25 = vld [vmem:[%s8261_s1 + $0x58] sm:$0xff]  ;;  %v4428_v3 = vrot.slane %v4417_v38, 7 }
 0x83b   : > { %6704 = vmatmul.mubr.msk.f32.vlgmr.msra.gmra.mxu1 %vm243_vm4, %v7827_v0  ;;  %6711 = vmatprep.subr.mxu1 %v7048_v2 }
 0x83c   : > { %v2959_v52 = vcombine.high %v2957_v5, %v2957_v5  ;;  %v2966_v53 = vrot.slane %v2957_v5, %v7423_v45  ;;  %6713 = vmatprep.mubr.msk.f32.mxu1 %vm7049_vm2, %v7048_v2  ;;  %v4416_v5 = vld [vmem:[%s7190_s7 + $0x6] sm:$0x1] }
 0x83e   : > { %v2973_v7 = vrot.slane %v2959_v52, %v7423_v45  ;;  %v2974_v46 = vcombine.high %v2966_v53, %v2966_v53  ;;  %v2982_v54 = vrot.slane %v2966_v53, %v7423_v45  ;;  %v4419_v52 = vld [vmem:[%s7190_s7 + $0x1e] sm:$0x1]  ;;  %v4430_v53 = vrot.slane %v4418_v43, 6 }
 0x840   : > { %v2975_v55 = vcombine.high %v2973_v7, %v2973_v7  ;;  %v2989_v57 = vrot.slane %v2973_v7, %v7423_v45  ;;  %v2996_v58 = vrot.slane %v2974_v46, %v7423_v45  ;;  %v3004_v59 = vcombine.high %v2982_v54, %v2982_v54  ;;  %3016 = vst.msk [vmem:[%s7443_s5 + $0x3] sm:$0x1] %vm927_vm7, %v2982_v54 }
 0x841   : > { %v4429_v7 = vsel %vm235_vm0, %v4428_v3, %v4416_v5  ;;  %v4432_v46 = vrot.slane %v4419_v52, 5 }
 0x842   : > { %v3003_v60 = vrot.slane %v2975_v55, %v7423_v45  ;;  %v3005_v61 = vcombine.high %v2989_v57, %v2989_v57  ;;  %v3006_v63 = vcombine.high %v2996_v58, %v2996_v58  ;;  %3017 = vst.msk [vmem:[%s7443_s5 + $0xb] sm:$0x1] %vm927_vm7, %v2996_v58  ;;  %3018 = vst.msk [vmem:[%s7443_s5 + $0x13] sm:$0x1] %vm927_vm7, %v3004_v59 }
 0x843   : > { %3020 = vst.msk [vmem:[%s7443_s5 + $0x23] sm:$0x1] %vm927_vm7, %v2989_v57  ;;  %v4431_v54 = vsel %vm238_vm1, %v4430_v53, %v4429_v7 }
 0x844   : > { %v3007_v9 = vcombine.high %v3003_v60, %v3003_v60  ;;  %3019 = vst.msk [vmem:[%s7443_s5 + $0x1b] sm:$0x1] %vm927_vm7, %v3006_v63  ;;  %3021 = vst.msk [vmem:[%s7443_s5 + $0x2b] sm:$0x1] %vm927_vm7, %v3003_v60 }
 0x845   : > { %3022 = vst.msk [vmem:[%s7443_s5 + $0x33] sm:$0x1] %vm927_vm7, %v3005_v61 }
 0x846   : > { %3023 = vst.msk [vmem:[%s7443_s5 + $0x3b] sm:$0x1] %vm927_vm7, %v3007_v9 }
 0x8df   : > { %v3338_v10 = vpop.f32.mrf.mxu1 }
 0x8e0   : > { %v3339_v12 = vadd.f32 %v3338_v10, %v7750_v4 }
 0x8e1   : > { %v6651_v11 = vpop.f32.mrf.mxu1 }
 0x8eb   : > { %v3489_v13 = vpop.f32.mrf.mxu1 }
 0x8ec   : > { %v3493_v15 = vadd.f32 %v3489_v13, %v3339_v12 }
 0x8ed   : > { %v6667_v17 = vpop.f32.mrf.mxu1 }
 0x8f3   : > { %v3564_v21 = vpop.f32.mrf.mxu1 }
 0x8f4   : > { %6680 = vmatpush3.msk.msra.mxu0 %vm398_vm5, %v3564_v21 }
 0x8f5   : > { %v6678_v23 = vpop.f32.mrf.mxu1  ;;  %6682 = vmatmul.mubr.msk.f32.vlgmr.msra.gmra.mxu0 %vm394_vm6, %v7862_v20  ;;  %6684 = vmatprep.subr.mxu0 %v7048_v2 }
 0x8f6   : > { %6685 = vmatpush3.msra.mxu0 %v7680_v16  ;;  %6692 = vmatprep.mubr.msk.f32.mxu0 %vm7049_vm2, %v7048_v2 }
 0x8f7   : > { %6686 = vmatprep.subr.mxu0 %v7048_v2 }
 0x8f8   : > { %6687 = vmatpush3.msra.mxu0 %v7689_v14 }
 0x8f9   : > { %6688 = vmatprep.subr.mxu0 %v7048_v2 }
 0x8fa   : > { %6689 = vmatpush3.msra.mxu0 %v7698_v18 }
 0x8fb   : > { %6690 = vmatprep.subr.mxu0 %v7048_v2  ;;  %v3881_v26 = vpop.f32.mrf.mxu1 }
 0x8fc   : > { %6691 = vmatpush3.msra.mxu0 %v7705_v56 }
 0x8fd   : > { %6693 = vmatmul.mubr.msk.f32.vlgmr.msra.gmra.mxu0 %vm243_vm4, %v7827_v0  ;;  %v6705_v29 = vpop.f32.mrf.mxu1  ;;  %6706 = vmatprep.subr.mxu0 %v7048_v2 }
 0x8fe   : > { %6707 = vmatpush3.msk.msra.mxu0 %vm398_vm5, %v3881_v26  ;;  %6708 = vmatprep.mubr.msk.f32.mxu0 %vm7049_vm2, %v7048_v2 }
 0x8ff   : > { %6716 = vmatprep.subr.mxu0 %v7048_v2 }
 0x901   : > { %6709 = vmatmul.mubr.msk.f32.vlgmr.msra.gmra.mxu0 %vm394_vm6, %v7719_v24 }
 0x902   : > { %6717 = vmatpush3.msra.mxu0 %v7887_v25  ;;  %6724 = vmatprep.mubr.msk.f32.mxu0 %vm7049_vm2, %v7048_v2 }
 0x903   : > { %6718 = vmatprep.subr.mxu0 %v7048_v2 }
 0x904   : > { %6719 = vmatpush3.msra.mxu0 %v7894_v30 }
 0x905   : > { %6720 = vmatprep.subr.mxu0 %v7048_v2 }
 0x906   : > { %6721 = vmatpush3.msra.mxu0 %v7903_v28 }
 0x907   : > { %6722 = vmatprep.subr.mxu0 %v7048_v2 }
 0x908   : > { %6723 = vmatpush3.msra.mxu0 %v7910_v1 }
 0x909   : > { %6725 = vmatmul.mubr.msk.f32.vlgmr.msra.gmra.mxu0 %vm243_vm4, %v7827_v0  ;;  %6743 = vmatprep.subr.mxu0 %v7048_v2 }
 0x90a   : > { %6745 = vmatprep.mubr.msk.f32.mxu0 %vm7049_vm2, %v7048_v2 }
 0x9b5   : > { %v3641_v4 = vpop.f32.mrf.mxu0 }
 0x9b6   : > { %v3645_v6 = vadd.f32 %v3641_v4, %v3493_v15 }
 0x9b7   : > { %v6683_v19 = vpop.f32.mrf.mxu0 }
 0x9b8   : > { %v3646_v31 = vadd.f32 %v3645_v6, %v7383_v62 }
 0x9ba   : > { %v6048_v33 = vmul.f32 -1.442695, %v3646_v31 }
 0x9bc   : > { %6954 = vpow2.f32 %v6048_v33 }
 0x9bd   : > { %v3806_v35 = vpop.f32.mrf.mxu0 }
 0x9be   : > { %6712 = vmatpush3.msk.msra.mxu1 %vm398_vm5, %v3806_v35 }
 0x9bf   : > { %v6694_v39 = vpop.f32.mrf.mxu0  ;;  %6714 = vmatmul.mubr.msk.f32.vlgmr.msra.gmra.mxu1 %vm394_vm6, %v7742_v27  ;;  %6727 = vmatprep.subr.mxu1 %v7048_v2 }
 0x9c0   : > { %6729 = vmatprep.mubr.msk.f32.mxu1 %vm7049_vm2, %v7048_v2 }
 0x9c1   : > { %v7927_v42 = vpop.f32.mrf.mxu0 }
 0x9c3   : > { %v6710_v44 = vpop.f32.mrf.mxu0 }
 0x9c9   : > { %v6955_v47 = vpop.eup %6954  ;;  %v4108_v49 = vpop.f32.mrf.mxu0 }
 0x9ca   : > { %v3650_v34 = vadd.f32 1.0, %v6955_v47  ;;  %6728 = vmatpush3.msk.msra.mxu1 %vm398_vm5, %v4108_v49 }
 0x9cb   : > { %v6726_v50 = vpop.f32.mrf.mxu0  ;;  %6730 = vmatmul.mubr.msk.f32.vlgmr.msra.gmra.mxu1 %vm394_vm6, %v7755_v8  ;;  %6732 = vmatprep.subr.mxu1 %v7048_v2 }
 0x9cc   : > { %6956 = vrcp.f32 %v3650_v34  ;;  %6733 = vmatpush3.msra.mxu1 %v7760_v32  ;;  %6740 = vmatprep.mubr.msk.f32.mxu1 %vm7049_vm2, %v7048_v2 }
 0x9cd   : > { %6734 = vmatprep.subr.mxu1 %v7048_v2 }
 0x9ce   : > { %6735 = vmatpush3.msra.mxu1 %v7769_v37 }
 0x9cf   : > { %6736 = vmatprep.subr.mxu1 %v7048_v2 }
 0x9d0   : > { %6737 = vmatpush3.msra.mxu1 %v7779_v41 }
 0x9d1   : > { %6738 = vmatprep.subr.mxu1 %v7048_v2 }
 0x9d2   : > { %6739 = vmatpush3.msra.mxu1 %v7787_v22 }
 0x9d3   : > { %6741 = vmatmul.mubr.msk.f32.vlgmr.msra.gmra.mxu1 %vm243_vm4, %v7827_v0  ;;  %6759 = vmatprep.subr.mxu1 %v7048_v2  ;;  %v7959_v0 = vsel %vm241_vm3, %v4432_v46, %v4431_v54  ;;  %v5113_v46 = vld [vmem:[%s7190_s7 + $0xf] sm:$0x1]  ;;  %v5114_v54 = vld [vmem:[%s7190_s7 + $0x17] sm:$0x1] }
 0x9d4   : > { %6760 = vmatpush3.msra.mxu1 %v7795_v48  ;;  %6767 = vmatprep.mubr.msk.f32.mxu1 %vm7049_vm2, %v7048_v2 }
 0x9d5   : > { %6761 = vmatprep.subr.mxu1 %v7048_v2 }
 0x9d6   : > { %6762 = vmatpush3.msra.mxu1 %v7806_v36 }
 0x9d7   : > { %6763 = vmatprep.subr.mxu1 %v7048_v2 }
 0x9d8   : > { %6764 = vmatpush3.msra.mxu1 %v7815_v40 }
 0x9d9   : > { %v6957_v55 = vpop.eup %6956  ;;  %6765 = vmatprep.subr.mxu1 %v7048_v2 }
 0x9da   : > { %v3653_v57 = vmul.f32 %v6957_v55, %v3646_v31  ;;  %6766 = vmatpush3.msra.mxu1 %v7823_v51  ;;  %v5124_v55 = vrot.slane %v5113_v46, 7 }
 0x9db   : > { %6768 = vmatmul.mubr.msk.f32.vlgmr.msra.gmra.mxu1 %vm243_vm4, %v7959_v0  ;;  %6775 = vmatprep.subr.mxu1 %v7048_v2 }
 0x9dc   : > { %v3655_v58 = vcombine.high %v3653_v57, %v3653_v57  ;;  %v3662_v59 = vrot.slane %v3653_v57, %v7423_v45  ;;  %6777 = vmatprep.mubr.msk.f32.mxu1 %vm7049_vm2, %v7048_v2  ;;  %v5112_v57 = vld [vmem:[%s7190_s7 + $0x7] sm:$0x1] }
 0x9de   : > { %v3669_v60 = vrot.slane %v3655_v58, %v7423_v45  ;;  %v3670_v61 = vcombine.high %v3662_v59, %v3662_v59  ;;  %v3678_v63 = vrot.slane %v3662_v59, %v7423_v45  ;;  %v5115_v58 = vld [vmem:[%s7190_s7 + $0x1f] sm:$0x1]  ;;  %v5126_v59 = vrot.slane %v5114_v54, 6  ;;  %s6139_s7 = sshll.u32 %s7038_s18, 10  ;;  %s8215_s18 = scalar_lea.sflag [#allocation3], %s210_s29 }
 0x9df   : > { %s8201_s11 = scalar_lea.hbm %s8264_s4, %s6139_s7 }
 0x9e0   : > { %v3671_v9 = vcombine.high %v3669_v60, %v3669_v60  ;;  %v3685_v10 = vrot.slane %v3669_v60, %v7423_v45  ;;  %v3692_v11 = vrot.slane %v3670_v61, %v7423_v45  ;;  %v3700_v12 = vcombine.high %v3678_v63, %v3678_v63  ;;  %3712 = vst.msk [vmem:[%s7443_s5 + $0x4] sm:$0x1] %vm927_vm7, %v3678_v63 }
 0x9e1   : > { %v5125_v60 = vsel %vm235_vm0, %v5124_v55, %v5112_v57  ;;  %v5128_v61 = vrot.slane %v5115_v58, 5 }
 0x9e2   : > { %v3699_v13 = vrot.slane %v3671_v9, %v7423_v45  ;;  %v3701_v15 = vcombine.high %v3685_v10, %v3685_v10  ;;  %v3702_v17 = vcombine.high %v3692_v11, %v3692_v11  ;;  %3713 = vst.msk [vmem:[%s7443_s5 + $0xc] sm:$0x1] %vm927_vm7, %v3692_v11  ;;  %3714 = vst.msk [vmem:[%s7443_s5 + $0x14] sm:$0x1] %vm927_vm7, %v3700_v12 }
 0x9e3   : > { %3716 = vst.msk [vmem:[%s7443_s5 + $0x24] sm:$0x1] %vm927_vm7, %v3685_v10  ;;  %v5127_v63 = vsel %vm238_vm1, %v5126_v59, %v5125_v60 }
 0x9e4   : > { %v3703_v21 = vcombine.high %v3699_v13, %v3699_v13  ;;  %3715 = vst.msk [vmem:[%s7443_s5 + $0x1c] sm:$0x1] %vm927_vm7, %v3702_v17  ;;  %3717 = vst.msk [vmem:[%s7443_s5 + $0x2c] sm:$0x1] %vm927_vm7, %v3699_v13 }
 0x9e5   : > { %3718 = vst.msk [vmem:[%s7443_s5 + $0x34] sm:$0x1] %vm927_vm7, %v3701_v15 }
 0x9e6   : > { %3719 = vst.msk [vmem:[%s7443_s5 + $0x3c] sm:$0x1] %vm927_vm7, %v3703_v21 }
 0xa7f   : > { %v4034_v23 = vpop.f32.mrf.mxu1 }
 0xa80   : > { %v4035_v29 = vadd.f32 %v4034_v23, %v7927_v42 }
 0xa81   : > { %v6715_v26 = vpop.f32.mrf.mxu1 }
 0xa8b   : > { %v4185_v4 = vpop.f32.mrf.mxu1 }
 0xa8c   : > { %v4189_v6 = vadd.f32 %v4185_v4, %v4035_v29 }
 0xa8d   : > { %v6731_v19 = vpop.f32.mrf.mxu1 }
 0xa93   : > { %v4260_v31 = vpop.f32.mrf.mxu1 }
 0xa94   : > { %6744 = vmatpush3.msk.msra.mxu0 %vm398_vm5, %v4260_v31 }
 0xa95   : > { %v6742_v33 = vpop.f32.mrf.mxu1  ;;  %6746 = vmatmul.mubr.msk.f32.vlgmr.msra.gmra.mxu0 %vm394_vm6, %v7862_v20  ;;  %6748 = vmatprep.subr.mxu0 %v7048_v2 }
 0xa96   : > { %6749 = vmatpush3.msra.mxu0 %v7680_v16  ;;  %6756 = vmatprep.mubr.msk.f32.mxu0 %vm7049_vm2, %v7048_v2 }
 0xa97   : > { %6750 = vmatprep.subr.mxu0 %v7048_v2 }
 0xa98   : > { %6751 = vmatpush3.msra.mxu0 %v7689_v14 }
 0xa99   : > { %6752 = vmatprep.subr.mxu0 %v7048_v2 }
 0xa9a   : > { %6753 = vmatpush3.msra.mxu0 %v7698_v18 }
 0xa9b   : > { %6754 = vmatprep.subr.mxu0 %v7048_v2  ;;  %v4577_v35 = vpop.f32.mrf.mxu1 }
 0xa9c   : > { %6755 = vmatpush3.msra.mxu0 %v7705_v56 }
 0xa9d   : > { %6757 = vmatmul.mubr.msk.f32.vlgmr.msra.gmra.mxu0 %vm243_vm4, %v7959_v0  ;;  %v6769_v39 = vpop.f32.mrf.mxu1  ;;  %6770 = vmatprep.subr.mxu0 %v7048_v2 }
 0xa9e   : > { %6771 = vmatpush3.msk.msra.mxu0 %vm398_vm5, %v4577_v35  ;;  %6772 = vmatprep.mubr.msk.f32.mxu0 %vm7049_vm2, %v7048_v2 }
 0xa9f   : > { %6780 = vmatprep.subr.mxu0 %v7048_v2 }
 0xaa1   : > { %6773 = vmatmul.mubr.msk.f32.vlgmr.msra.gmra.mxu0 %vm394_vm6, %v7719_v24 }
 0xaa2   : > { %6781 = vmatpush3.msra.mxu0 %v7887_v25  ;;  %6788 = vmatprep.mubr.msk.f32.mxu0 %vm7049_vm2, %v7048_v2 }
 0xaa3   : > { %6782 = vmatprep.subr.mxu0 %v7048_v2 }
 0xaa4   : > { %6783 = vmatpush3.msra.mxu0 %v7894_v30 }
 0xaa5   : > { %6784 = vmatprep.subr.mxu0 %v7048_v2 }
 0xaa6   : > { %6785 = vmatpush3.msra.mxu0 %v7903_v28 }
 0xaa7   : > { %6786 = vmatprep.subr.mxu0 %v7048_v2 }
 0xaa8   : > { %6787 = vmatpush3.msra.mxu0 %v7910_v1 }
 0xaa9   : > { %6789 = vmatmul.mubr.msk.f32.vlgmr.msra.gmra.mxu0 %vm243_vm4, %v7959_v0  ;;  %6807 = vmatprep.subr.mxu0 %v7048_v2 }
 0xaaa   : > { %6809 = vmatprep.mubr.msk.f32.mxu0 %vm7049_vm2, %v7048_v2 }
 0xb55   : > { %v4337_v42 = vpop.f32.mrf.mxu0 }
 0xb56   : > { %v4341_v44 = vadd.f32 %v4337_v42, %v4189_v6 }
 0xb57   : > { %v6747_v47 = vpop.f32.mrf.mxu0 }
 0xb58   : > { %v4342_v49 = vadd.f32 %v4341_v44, %v7383_v62 }
 0xb5a   : > { %v6076_v34 = vmul.f32 -1.442695, %v4342_v49 }
 0xb5c   : > { %6958 = vpow2.f32 %v6076_v34 }
 0xb5d   : > { %v4502_v50 = vpop.f32.mrf.mxu0 }
 0xb5e   : > { %6776 = vmatpush3.msk.msra.mxu1 %vm398_vm5, %v4502_v50 }
 0xb5f   : > { %v6758_v38 = vpop.f32.mrf.mxu0  ;;  %6778 = vmatmul.mubr.msk.f32.vlgmr.msra.gmra.mxu1 %vm394_vm6, %v7742_v27  ;;  %6791 = vmatprep.subr.mxu1 %v7048_v2 }
 0xb60   : > { %6793 = vmatprep.mubr.msk.f32.mxu1 %vm7049_vm2, %v7048_v2 }
 0xb61   : > { %v8034_v43 = vpop.f32.mrf.mxu0 }
 0xb63   : > { %v6774_v3 = vpop.f32.mrf.mxu0 }
 0xb69   : > { %v6959_v5 = vpop.eup %6958  ;;  %v4804_v52 = vpop.f32.mrf.mxu0 }
 0xb6a   : > { %v4346_v53 = vadd.f32 1.0, %v6959_v5  ;;  %6792 = vmatpush3.msk.msra.mxu1 %vm398_vm5, %v4804_v52 }
 0xb6b   : > { %v6790_v7 = vpop.f32.mrf.mxu0  ;;  %6794 = vmatmul.mubr.msk.f32.vlgmr.msra.gmra.mxu1 %vm394_vm6, %v7755_v8  ;;  %6796 = vmatprep.subr.mxu1 %v7048_v2 }
 0xb6c   : > { %6960 = vrcp.f32 %v4346_v53  ;;  %6797 = vmatpush3.msra.mxu1 %v7760_v32  ;;  %6804 = vmatprep.mubr.msk.f32.mxu1 %vm7049_vm2, %v7048_v2 }
 0xb6d   : > { %6798 = vmatprep.subr.mxu1 %v7048_v2 }
 0xb6e   : > { %6799 = vmatpush3.msra.mxu1 %v7769_v37 }
 0xb6f   : > { %6800 = vmatprep.subr.mxu1 %v7048_v2 }
 0xb70   : > { %6801 = vmatpush3.msra.mxu1 %v7779_v41 }
 0xb71   : > { %6802 = vmatprep.subr.mxu1 %v7048_v2 }
 0xb72   : > { %6803 = vmatpush3.msra.mxu1 %v7787_v22 }
 0xb73   : > { %6805 = vmatmul.mubr.msk.f32.vlgmr.msra.gmra.mxu1 %vm243_vm4, %v7959_v0  ;;  %6823 = vmatprep.subr.mxu1 %v7048_v2  ;;  %v8066_v0 = vsel %vm241_vm3, %v5128_v61, %v5127_v63 }
 0xb74   : > { %6824 = vmatpush3.msra.mxu1 %v7795_v48  ;;  %6831 = vmatprep.mubr.msk.f32.mxu1 %vm7049_vm2, %v7048_v2 }
 0xb75   : > { %6825 = vmatprep.subr.mxu1 %v7048_v2 }
 0xb76   : > { %6826 = vmatpush3.msra.mxu1 %v7806_v36 }
 0xb77   : > { %6827 = vmatprep.subr.mxu1 %v7048_v2 }
 0xb78   : > { %6828 = vmatpush3.msra.mxu1 %v7815_v40 }
 0xb79   : > { %v6961_v9 = vpop.eup %6960  ;;  %6829 = vmatprep.subr.mxu1 %v7048_v2 }
 0xb7a   : > { %v4349_v48 = vmul.f32 %v6961_v9, %v4342_v49  ;;  %6830 = vmatpush3.msra.mxu1 %v7823_v51 }
 0xb7b   : > { %6832 = vmatmul.mubr.msk.f32.vlgmr.msra.gmra.mxu1 %vm243_vm4, %v8066_v0  ;;  %6839 = vmatprep.subr.mxu1 %v7048_v2 }
 0xb7c   : > { %v4351_v36 = vcombine.high %v4349_v48, %v4349_v48  ;;  %v4358_v40 = vrot.slane %v4349_v48, %v7423_v45  ;;  %6841 = vmatprep.mubr.msk.f32.mxu1 %vm7049_vm2, %v7048_v2 }
 0xb7e   : > { %v4365_v10 = vrot.slane %v4351_v36, %v7423_v45  ;;  %v4366_v11 = vcombine.high %v4358_v40, %v4358_v40  ;;  %v4374_v51 = vrot.slane %v4358_v40, %v7423_v45 }
 0xb80   : > { %v4367_v12 = vcombine.high %v4365_v10, %v4365_v10  ;;  %v4381_v13 = vrot.slane %v4365_v10, %v7423_v45  ;;  %v4388_v15 = vrot.slane %v4366_v11, %v7423_v45  ;;  %v4396_v17 = vcombine.high %v4374_v51, %v4374_v51  ;;  %4408 = vst.msk [vmem:[%s7443_s5 + $0x5] sm:$0x1] %vm927_vm7, %v4374_v51 }
 0xb82   : > { %v4395_v21 = vrot.slane %v4367_v12, %v7423_v45  ;;  %v4397_v23 = vcombine.high %v4381_v13, %v4381_v13  ;;  %v4398_v26 = vcombine.high %v4388_v15, %v4388_v15  ;;  %4409 = vst.msk [vmem:[%s7443_s5 + $0xd] sm:$0x1] %vm927_vm7, %v4388_v15  ;;  %4410 = vst.msk [vmem:[%s7443_s5 + $0x15] sm:$0x1] %vm927_vm7, %v4396_v17 }
 0xb83   : > { %4412 = vst.msk [vmem:[%s7443_s5 + $0x25] sm:$0x1] %vm927_vm7, %v4381_v13 }
 0xb84   : > { %v4399_v29 = vcombine.high %v4395_v21, %v4395_v21  ;;  %4411 = vst.msk [vmem:[%s7443_s5 + $0x1d] sm:$0x1] %vm927_vm7, %v4398_v26  ;;  %4413 = vst.msk [vmem:[%s7443_s5 + $0x2d] sm:$0x1] %vm927_vm7, %v4395_v21 }
 0xb85   : > { %4414 = vst.msk [vmem:[%s7443_s5 + $0x35] sm:$0x1] %vm927_vm7, %v4397_v23 }
 0xb86   : > { %4415 = vst.msk [vmem:[%s7443_s5 + $0x3d] sm:$0x1] %vm927_vm7, %v4399_v29 }
 0xc1f   : > { %v4730_v4 = vpop.f32.mrf.mxu1 }
 0xc20   : > { %v4731_v19 = vadd.f32 %v4730_v4, %v8034_v43 }
 0xc21   : > { %v6779_v6 = vpop.f32.mrf.mxu1 }
 0xc2b   : > { %v4881_v31 = vpop.f32.mrf.mxu1 }
 0xc2c   : > { %v4885_v33 = vadd.f32 %v4881_v31, %v4731_v19 }
 0xc2d   : > { %v6795_v35 = vpop.f32.mrf.mxu1 }
 0xc33   : > { %v4956_v39 = vpop.f32.mrf.mxu1 }
 0xc34   : > { %6808 = vmatpush3.msk.msra.mxu0 %vm398_vm5, %v4956_v39 }
 0xc35   : > { %v6806_v42 = vpop.f32.mrf.mxu1  ;;  %6810 = vmatmul.mubr.msk.f32.vlgmr.msra.gmra.mxu0 %vm394_vm6, %v7862_v20  ;;  %6812 = vmatprep.subr.mxu0 %v7048_v2 }
 0xc36   : > { %6813 = vmatpush3.msra.mxu0 %v7680_v16  ;;  %6820 = vmatprep.mubr.msk.f32.mxu0 %vm7049_vm2, %v7048_v2 }
 0xc37   : > { %6814 = vmatprep.subr.mxu0 %v7048_v2 }
 0xc38   : > { %6815 = vmatpush3.msra.mxu0 %v7689_v14 }
 0xc39   : > { %6816 = vmatprep.subr.mxu0 %v7048_v2 }
 0xc3a   : > { %6817 = vmatpush3.msra.mxu0 %v7698_v18 }
 0xc3b   : > { %6818 = vmatprep.subr.mxu0 %v7048_v2  ;;  %v5273_v44 = vpop.f32.mrf.mxu1 }
 0xc3c   : > { %6819 = vmatpush3.msra.mxu0 %v7705_v56 }
 0xc3d   : > { %6821 = vmatmul.mubr.msk.f32.vlgmr.msra.gmra.mxu0 %vm243_vm4, %v8066_v0  ;;  %v6833_v16 = vpop.f32.mrf.mxu1  ;;  %6834 = vmatprep.subr.mxu0 %v7048_v2 }
 0xc3e   : > { %6835 = vmatpush3.msk.msra.mxu0 %vm398_vm5, %v5273_v44  ;;  %6836 = vmatprep.mubr.msk.f32.mxu0 %vm7049_vm2, %v7048_v2 }
 0xc3f   : > { %6844 = vmatprep.subr.mxu0 %v7048_v2 }
 0xc41   : > { %6837 = vmatmul.mubr.msk.f32.vlgmr.msra.gmra.mxu0 %vm394_vm6, %v7719_v24 }
 0xc42   : > { %6845 = vmatpush3.msra.mxu0 %v7887_v25  ;;  %6852 = vmatprep.mubr.msk.f32.mxu0 %vm7049_vm2, %v7048_v2 }
 0xc43   : > { %6846 = vmatprep.subr.mxu0 %v7048_v2 }
 0xc44   : > { %6847 = vmatpush3.msra.mxu0 %v7894_v30 }
 0xc45   : > { %6848 = vmatprep.subr.mxu0 %v7048_v2 }
 0xc46   : > { %6849 = vmatpush3.msra.mxu0 %v7903_v28 }
 0xc47   : > { %6850 = vmatprep.subr.mxu0 %v7048_v2 }
 0xc48   : > { %6851 = vmatpush3.msra.mxu0 %v7910_v1 }
 0xc49   : > { %6853 = vmatmul.mubr.msk.f32.vlgmr.msra.gmra.mxu0 %vm243_vm4, %v8066_v0  ;;  %6871 = vmatprep.subr.mxu0 %v7048_v2 }
 0xc4a   : > { %6873 = vmatprep.mubr.msk.f32.mxu0 %vm7049_vm2, %v7048_v2 }
 0xcf5   : > { %v5033_v14 = vpop.f32.mrf.mxu0 }
 0xcf6   : > { %v5037_v18 = vadd.f32 %v5033_v14, %v4885_v33 }
 0xcf7   : > { %v6811_v56 = vpop.f32.mrf.mxu0 }
 0xcf8   : > { %v5038_v24 = vadd.f32 %v5037_v18, %v7383_v62 }
 0xcfa   : > { %v6104_v25 = vmul.f32 -1.442695, %v5038_v24 }
 0xcfc   : > { %6962 = vpow2.f32 %v6104_v25 }
 0xcfd   : > { %v5198_v30 = vpop.f32.mrf.mxu0 }
 0xcfe   : > { %6840 = vmatpush3.msk.msra.mxu1 %vm398_vm5, %v5198_v30 }
 0xcff   : > { %v6822_v28 = vpop.f32.mrf.mxu0  ;;  %6842 = vmatmul.mubr.msk.f32.vlgmr.msra.gmra.mxu1 %vm394_vm6, %v7742_v27  ;;  %6855 = vmatprep.subr.mxu1 %v7048_v2 }
 0xd00   : > { %6857 = vmatprep.mubr.msk.f32.mxu1 %vm7049_vm2, %v7048_v2 }
 0xd01   : > { %v5350_v1 = vpop.f32.mrf.mxu0 }
 0xd03   : > { %v6838_v47 = vpop.f32.mrf.mxu0 }
 0xd09   : > { %v6963_v49 = vpop.eup %6962  ;;  %v5500_v34 = vpop.f32.mrf.mxu0 }
 0xd0a   : > { %v5042_v50 = vadd.f32 1.0, %v6963_v49  ;;  %6856 = vmatpush3.msk.msra.mxu1 %vm398_vm5, %v5500_v34 }
 0xd0b   : > { %v6854_v38 = vpop.f32.mrf.mxu0  ;;  %6858 = vmatmul.mubr.msk.f32.vlgmr.msra.gmra.mxu1 %vm394_vm6, %v7755_v8  ;;  %6860 = vmatprep.subr.mxu1 %v7048_v2 }
 0xd0c   : > { %6964 = vrcp.f32 %v5042_v50  ;;  %6861 = vmatpush3.msra.mxu1 %v7760_v32  ;;  %6868 = vmatprep.mubr.msk.f32.mxu1 %vm7049_vm2, %v7048_v2 }
 0xd0d   : > { %6862 = vmatprep.subr.mxu1 %v7048_v2 }
 0xd0e   : > { %6863 = vmatpush3.msra.mxu1 %v7769_v37 }
 0xd0f   : > { %6864 = vmatprep.subr.mxu1 %v7048_v2 }
 0xd10   : > { %6865 = vmatpush3.msra.mxu1 %v7779_v41 }
 0xd11   : > { %6866 = vmatprep.subr.mxu1 %v7048_v2 }
 0xd12   : > { %6867 = vmatpush3.msra.mxu1 %v7787_v22 }
 0xd13   : > { %6869 = vmatmul.mubr.msk.f32.vlgmr.msra.gmra.mxu1 %vm243_vm4, %v8066_v0 }
 0xd19   : > { %v6965_v27 = vpop.eup %6964 }
 0xd1a   : > { %v5045_v8 = vmul.f32 %v6965_v27, %v5038_v24 }
 0xd1c   : > { %v5047_v32 = vcombine.high %v5045_v8, %v5045_v8  ;;  %v5054_v37 = vrot.slane %v5045_v8, %v7423_v45 }
 0xd1e   : > { %v5061_v43 = vrot.slane %v5047_v32, %v7423_v45  ;;  %v5062_v41 = vcombine.high %v5054_v37, %v5054_v37  ;;  %v5070_v2 = vrot.slane %v5054_v37, %v7423_v45 }
 0xd20   : > { %v5063_v22 = vcombine.high %v5061_v43, %v5061_v43  ;;  %v5077_v3 = vrot.slane %v5061_v43, %v7423_v45  ;;  %v5084_v5 = vrot.slane %v5062_v41, %v7423_v45  ;;  %v5092_v52 = vcombine.high %v5070_v2, %v5070_v2  ;;  %5104 = vst.msk [vmem:[%s7443_s5 + $0x6] sm:$0x1] %vm927_vm7, %v5070_v2 }
 0xd22   : > { %v5091_v53 = vrot.slane %v5063_v22, %v7423_v45  ;;  %v5093_v7 = vcombine.high %v5077_v3, %v5077_v3  ;;  %v5094_v46 = vcombine.high %v5084_v5, %v5084_v5  ;;  %5105 = vst.msk [vmem:[%s7443_s5 + $0xe] sm:$0x1] %vm927_vm7, %v5084_v5  ;;  %5106 = vst.msk [vmem:[%s7443_s5 + $0x16] sm:$0x1] %vm927_vm7, %v5092_v52 }
 0xd23   : > { %5108 = vst.msk [vmem:[%s7443_s5 + $0x26] sm:$0x1] %vm927_vm7, %v5077_v3 }
 0xd24   : > { %v5095_v54 = vcombine.high %v5091_v53, %v5091_v53  ;;  %5107 = vst.msk [vmem:[%s7443_s5 + $0x1e] sm:$0x1] %vm927_vm7, %v5094_v46  ;;  %5109 = vst.msk [vmem:[%s7443_s5 + $0x2e] sm:$0x1] %vm927_vm7, %v5091_v53 }
 0xd25   : > { %5110 = vst.msk [vmem:[%s7443_s5 + $0x36] sm:$0x1] %vm927_vm7, %v5093_v7 }
 0xd26   : > { %5111 = vst.msk [vmem:[%s7443_s5 + $0x3e] sm:$0x1] %vm927_vm7, %v5095_v54 }
 0xdbf   : > { %v5426_v55 = vpop.f32.mrf.mxu1 }
 0xdc0   : > { %v5427_v58 = vadd.f32 %v5426_v55, %v5350_v1 }
 0xdc1   : > { %v6843_v57 = vpop.f32.mrf.mxu1 }
 0xdcb   : > { %v5577_v59 = vpop.f32.mrf.mxu1 }
 0xdcc   : > { %v5581_v60 = vadd.f32 %v5577_v59, %v5427_v58 }
 0xdcd   : > { %v6859_v61 = vpop.f32.mrf.mxu1 }
 0xdd3   : > { %v5652_v63 = vpop.f32.mrf.mxu1 }
 0xdd4   : > { %6872 = vmatpush3.msk.msra.mxu0 %vm398_vm5, %v5652_v63 }
 0xdd5   : > { %v6870_v0 = vpop.f32.mrf.mxu1  ;;  %6874 = vmatmul.mubr.msk.f32.vlgmr.msra.gmra.mxu0 %vm394_vm6, %v7862_v20 }
 0xe95   : > { %v5729_v9 = vpop.f32.mrf.mxu0 }
 0xe96   : > { %v5733_v48 = vadd.f32 %v5729_v9, %v5581_v60 }
 0xe97   : > { %v6875_v36 = vpop.f32.mrf.mxu0 }
 0xe98   : > { %v5734_v40 = vadd.f32 %v5733_v48, %v7383_v62 }
 0xe9a   : > { %v6132_v10 = vmul.f32 -1.442695, %v5734_v40 }
 0xe9c   : > { %6966 = vpow2.f32 %v6132_v10 }
 0xea9   : > { %v6967_v11 = vpop.eup %6966 }
 0xeaa   : > { %v5738_v51 = vadd.f32 1.0, %v6967_v11 }
 0xeac   : > { %6968 = vrcp.f32 %v5738_v51 }
 0xeb9   : > { %v6969_v12 = vpop.eup %6968 }
 0xeba   : > { %v5741_v13 = vmul.f32 %v6969_v12, %v5734_v40 }
 0xebc   : > { %v5743_v15 = vcombine.high %v5741_v13, %v5741_v13  ;;  %v5750_v20 = vrot.slane %v5741_v13, %v7423_v45 }
 0xebe   : > { %v5757_v17 = vrot.slane %v5743_v15, %v7423_v45  ;;  %v5758_v21 = vcombine.high %v5750_v20, %v5750_v20  ;;  %v5766_v62 = vrot.slane %v5750_v20, %v7423_v45 }
 0xec0   : > { %v5759_v23 = vcombine.high %v5757_v17, %v5757_v17  ;;  %v5773_v26 = vrot.slane %v5757_v17, %v7423_v45  ;;  %v5780_v29 = vrot.slane %v5758_v21, %v7423_v45  ;;  %v5788_v4 = vcombine.high %v5766_v62, %v5766_v62  ;;  %5800 = vst.msk [vmem:[%s7443_s5 + $0x7] sm:$0x1] %vm927_vm7, %v5766_v62 }
 0xec2   : > { %v5787_v6 = vrot.slane %v5759_v23, %v7423_v45  ;;  %v5789_v19 = vcombine.high %v5773_v26, %v5773_v26  ;;  %v5790_v31 = vcombine.high %v5780_v29, %v5780_v29  ;;  %5801 = vst.msk [vmem:[%s7443_s5 + $0xf] sm:$0x1] %vm927_vm7, %v5780_v29  ;;  %5802 = vst.msk [vmem:[%s7443_s5 + $0x17] sm:$0x1] %vm927_vm7, %v5788_v4 }
 0xec3   : > { %5804 = vst.msk [vmem:[%s7443_s5 + $0x27] sm:$0x1] %vm927_vm7, %v5773_v26 }
 0xec4   : > { %v5791_v45 = vcombine.high %v5787_v6, %v5787_v6  ;;  %5803 = vst.msk [vmem:[%s7443_s5 + $0x1f] sm:$0x1] %vm927_vm7, %v5790_v31  ;;  %5805 = vst.msk [vmem:[%s7443_s5 + $0x2f] sm:$0x1] %vm927_vm7, %v5787_v6 }
 0xec5   : > { %5806 = vst.msk [vmem:[%s7443_s5 + $0x37] sm:$0x1] %vm927_vm7, %v5789_v19 }
 0xec6   : > { %5807 = vst.msk [vmem:[%s7443_s5 + $0x3f] sm:$0x1] %vm927_vm7, %v5791_v45 }
 0xec7   : > { %6983 = shalt.err (!%p6980_p5)
}
 0xec8   : > { %s6984_s29 = scalar_lea.hbm %s8201_s11, 1024  ;;  %s6988_s24 = scalar_lea.hbm %s8264_s4, 2048 }
 0xec9   : > { %p6985_p6 = scmp.ne.s32.totalorder %s8201_s11, %s6984_s29  ;;  %p6989_p10 = scmp.lt.s32.totalorder %s8201_s11, %s8264_s4 }
 0xeca   : > { %p6990_p11 = scmp.lt.s32.totalorder %s6988_s24, %s6984_s29 }
 0xecb   : > { %p6986_p7 = pnand %p6985_p6, %p7120_p4 }
 0xecc   : > { %p6991_p12 = por %p6990_p11, %p6989_p10 }
 0xecd   : > { %p6987_p9 = pneg %p6986_p7 }
 0xecf   : > { %p6992_p13 = pnand %p6991_p12, %p6987_p9 }
 0xed1   : > { %6995 = shalt.err (!%p6992_p13)
}
 0xed2   : > { %s7053_s6 = smov 128   ;;  %s7054_s7 = smov 8  }
 0xed3   : > { %6876 = dma.vmem_to_hbm [thread:$0]  (%p7120_p4), %s8203_s8, 1024, %s8201_s11, %s8215_s18, %s7053_s6, %s7053_s6, %s7054_s7  }
 0xed4 PF: > { %p6882_p0 = scmp.ge.s32.totalorder %s7046_s20, 2  ;;  %s5838_s9 = sand.u32 1, %s7026_s15  }
 0xed5   : > { %s5839_s10 = scalar_lea.sflag [#allocation3], %s5838_s9 }
 0xed6   : > { %p6879_p1 = pnand %p6882_p0, %p7127_p8 }
 0xed8   : > { %p6880_p2 = pneg %p6879_p1 }
 0xeda   : > { %7021 = dma.done.wait (%p6880_p2), %s5839_s10, 1024  }
 0xedb   : > { %7023 = vsyncadd (%p6880_p2), %s5839_s10, 4294966272  ;;  %s17_s20 = sadd.s32 1, %s7046_s20   ;;  %s8267_s15 = smov %s7030_s16 }
 0xedc   : > { %p14_p3 = scmp.ge.s32.totalorder %s17_s20, 4   ;;  %s8268_s16 = smov %s7034_s17 }
 0xedd   : > { %s8269_s17 = smov %s7133_s28  ;;  %s8270_s18 = smov %s7042_s19 }
 0xede   : > { %s8271_s19 = smov %s8273_s23  ;;  %16 = sbr.rel (!%p14_p3) target bundleno = 4 (0x4), region = 77 }
 0xee3   :  { %5844 = vsyncpa [#allocation3], 1 }
 0xee4   :  { %5846 = vsyncpa [#allocation3 + $0x1], 1 }

</bundles_post_ra>
